<compile_context>
chip_gen: v7x
topology: tpu7x:2x2x1
jax: 0.10.0
libtpu: 0.0.40
codegen_flags: <defaults>
</compile_context>

<pallas_src>
import functools

import jax
import jax.numpy as jnp
from jax.experimental import pallas as pl
from jax.experimental.pallas import tpu as pltpu


def _round_up(x, m):
    return ((x + m - 1) // m) * m


_VMEM_LIMIT = 28 * 1024 * 1024  # conservative: fits v7x's 64 MiB physical VMEM


# ---------------------------------------------------------------------------
# Kernel 1: conv1 (1x1-as-matmul) + folded BN1 + ReLU, tiled over rows.
# ---------------------------------------------------------------------------
def _conv1_kernel(x_ref, w_ref, b_ref, o_ref):
    acc = jnp.dot(x_ref[...], w_ref[...], preferred_element_type=jnp.float32)
    o_ref[...] = jnp.maximum(acc + b_ref[...], 0.0).astype(o_ref.dtype)


def conv1x1_bn_relu(x2d, w, b, tm):
    m, k = x2d.shape
    n = w.shape[1]
    flops = 2 * m * k * n
    bytes_accessed = int(x2d.size) * 2 + int(w.size) * 2 + int(b.size) * 4 + m * n * 2
    return pl.pallas_call(
        _conv1_kernel,
        out_shape=jax.ShapeDtypeStruct((m, n), jnp.bfloat16),
        grid=(m // tm,),
        in_specs=[
            pl.BlockSpec((tm, k), lambda i: (i, 0)),
            pl.BlockSpec((k, n), lambda i: (0, 0)),
            pl.BlockSpec((1, n), lambda i: (0, 0)),
        ],
        out_specs=pl.BlockSpec((tm, n), lambda i: (i, 0)),
        compiler_params=pltpu.CompilerParams(
            dimension_semantics=("parallel",),
            vmem_limit_bytes=_VMEM_LIMIT),
        cost_estimate=pl.CostEstimate(
            flops=int(flops), transcendentals=0, bytes_accessed=int(bytes_accessed)),
    )(x2d, w, b)


# ---------------------------------------------------------------------------
# Kernel 2: conv2 (3x3, stride, im2col-in-VMEM) + BN2 + ReLU
#           + conv3 (1x1) + BN3 + identity residual + ReLU, gridded over batch.
# ---------------------------------------------------------------------------
def _block_kernel(hq_ref, w2_ref, b2_ref, w3_ref, b3_ref, id_ref, o_ref,
                  *, taps, ho, wo):
    rows = ho * wo
    acc = None
    for k, (p, r0, c0) in enumerate(taps):
        # contiguous tap slice of the (phase-decomposed, spatially padded) h1
        tap = hq_ref[0, p, r0:r0 + ho, c0:c0 + wo, :]          # (ho, wo, Cm_p) bf16
        tap = tap.reshape(rows, tap.shape[-1])
        d = jnp.dot(tap, w2_ref[k], preferred_element_type=jnp.float32)
        acc = d if acc is None else acc + d
    h2 = jnp.maximum(acc + b2_ref[...], 0.0).astype(jnp.bfloat16)
    out = jnp.dot(h2, w3_ref[...], preferred_element_type=jnp.float32)
    out = out + b3_ref[...] + id_ref[0]                        # identity pre-padded in glue
    o_ref[0] = jnp.maximum(out, 0.0)


def conv2_conv3_residual(hq, w2, b2, w3, b3, ident, *, taps, Ho, Wo):
    N, P, Hq, Wq, Cm_p = hq.shape
    Co_p = w3.shape[1]
    rows = Ho * Wo
    kern = functools.partial(_block_kernel, taps=taps, ho=Ho, wo=Wo)
    flops = 2 * N * rows * Cm_p * Cm_p * 9 + 2 * N * rows * Cm_p * Co_p
    bytes_accessed = (int(hq.size) * 2 + int(w2.size) * 2 + int(w3.size) * 2
                      + int(b2.size) * 4 + int(b3.size) * 4
                      + int(ident.size) * 4 + N * rows * Co_p * 4)
    return pl.pallas_call(
        kern,
        out_shape=jax.ShapeDtypeStruct((N, rows, Co_p), jnp.float32),
        grid=(N,),
        in_specs=[
            pl.BlockSpec((1, P, Hq, Wq, Cm_p), lambda n: (n, 0, 0, 0, 0)),
            pl.BlockSpec((9, Cm_p, Cm_p), lambda n: (0, 0, 0)),
            pl.BlockSpec((1, Cm_p), lambda n: (0, 0)),
            pl.BlockSpec((Cm_p, Co_p), lambda n: (0, 0)),
            pl.BlockSpec((1, Co_p), lambda n: (0, 0)),
            pl.BlockSpec((1, rows, Co_p), lambda n: (n, 0, 0)),
        ],
        out_specs=pl.BlockSpec((1, rows, Co_p), lambda n: (n, 0, 0)),
        compiler_params=pltpu.CompilerParams(
            dimension_semantics=("parallel",),
            vmem_limit_bytes=_VMEM_LIMIT),
        cost_estimate=pl.CostEstimate(
            flops=int(flops), transcendentals=0, bytes_accessed=int(bytes_accessed)),
    )(hq, w2, b2, w3, b3, ident)


# ---------------------------------------------------------------------------
# One-time parameter preparation: fold eval-mode BN, transpose to (K, N),
# zero-pad channel dims to lane multiples (128), cast weights to bf16.
# ---------------------------------------------------------------------------
def prepare_weights(params, eps=1e-5):
    Cm, Cin = params["w1"].shape[0], params["w1"].shape[1]
    Cout = params["w3"].shape[0]
    Cin_p, Cm_p, Co_p = _round_up(Cin, 128), _round_up(Cm, 128), _round_up(Cout, 128)

    def fold(w_mat, b, g, be, m, v):
        scale = g / jnp.sqrt(v + eps)
        return w_mat * scale[None, :], (b - m) * scale + be

    w1 = params["w1"][:, :, 0, 0].T                                   # (Cin, Cm)
    w1f, b1f = fold(w1, params["b1"], params["g1"], params["be1"],
                    params["m1"], params["v1"])
    w1f = jnp.pad(w1f, ((0, Cin_p - Cin), (0, Cm_p - Cm))).astype(jnp.bfloat16)
    b1f = jnp.pad(b1f, (0, Cm_p - Cm)).astype(jnp.float32).reshape(1, Cm_p)

    w2 = jnp.transpose(params["w2"], (2, 3, 1, 0)).reshape(9, Cm, Cm)  # (kh*3+kw, in, out)
    scale2 = params["g2"] / jnp.sqrt(params["v2"] + eps)
    w2f = w2 * scale2[None, None, :]
    b2f = (params["b2"] - params["m2"]) * scale2 + params["be2"]
    w2f = jnp.pad(w2f, ((0, 0), (0, Cm_p - Cm), (0, Cm_p - Cm))).astype(jnp.bfloat16)
    b2f = jnp.pad(b2f, (0, Cm_p - Cm)).astype(jnp.float32).reshape(1, Cm_p)

    w3 = params["w3"][:, :, 0, 0].T                                   # (Cm, Cout)
    w3f, b3f = fold(w3, params["b3"], params["g3"], params["be3"],
                    params["m3"], params["v3"])
    w3f = jnp.pad(w3f, ((0, Cm_p - Cm), (0, Co_p - Cout))).astype(jnp.bfloat16)
    b3f = jnp.pad(b3f, (0, Co_p - Cout)).astype(jnp.float32).reshape(1, Co_p)

    return {"w1": w1f, "b1": b1f, "w2": w2f, "b2": b2f, "w3": w3f, "b3": b3f}


# ---------------------------------------------------------------------------
# Forward pass (jitted; stride / c_out static).
# ---------------------------------------------------------------------------
@functools.partial(jax.jit, static_argnames=("stride", "c_out"))
def bottleneck_forward(x_nchw, prep, *, stride, c_out):
    w1, b1 = prep["w1"], prep["b1"]
    w2, b2 = prep["w2"], prep["b2"]
    w3, b3 = prep["w3"], prep["b3"]
    Cin_p, Cm_p = w1.shape
    Co_p = w3.shape[1]

    N, Cin, H, W = x_nchw.shape
    Ho, Wo = H // stride, W // stride

    # TODO(synk): accept NHWC directly (or fuse this transpose into the first
    # kernel) to avoid two full-tensor layout passes at the wrapper boundary.
    x = jnp.transpose(x_nchw, (0, 2, 3, 1)).astype(jnp.float32)        # NHWC

    # ---- kernel 1: conv1 (1x1) + bn1 + relu, tiled over rows ----
    x_bf = jnp.pad(x.astype(jnp.bfloat16), ((0, 0), (0, 0), (0, 0), (0, Cin_p - Cin)))
    M = N * H * W
    TM = 256 if M >= 256 else _round_up(M, 8)
    M_pad = _round_up(M, TM)
    x2d = x_bf.reshape(M, Cin_p)
    if M_pad > M:
        x2d = jnp.pad(x2d, ((0, M_pad - M), (0, 0)))
    h1_2d = conv1x1_bn_relu(x2d, w1, b1, TM)                           # (M_pad, Cm_p) bf16
    h1 = h1_2d[:M].reshape(N, H, W, Cm_p)

    # ---- glue: spatial zero-pad (+ phase split for stride 2) so all conv2
    #      taps become contiguous slices inside the kernel ----
    # TODO(synk): fusing conv1 into kernel 2 (halo-aware) would also remove
    # this single h1 HBM round-trip.
    h1p = jnp.pad(h1, ((0, 0), (1, 1), (1, 1), (0, 0)))
    if stride == 2:
        hq = h1p.reshape(N, Ho + 1, 2, Wo + 1, 2, Cm_p)
        hq = jnp.transpose(hq, (0, 2, 4, 1, 3, 5)).reshape(N, 4, Ho + 1, Wo + 1, Cm_p)
        taps = tuple((2 * (kh % 2) + (kw % 2), kh // 2, kw // 2)
                     for kh in range(3) for kw in range(3))
    else:
        hq = h1p.reshape(N, 1, H + 2, W + 2, Cm_p)
        taps = tuple((0, kh, kw) for kh in range(3) for kw in range(3))

    # ---- identity branch (glue): avg-pool + channel zero-pad to Co_p ----
    ident = x
    if stride == 2:
        ident = ident.reshape(N, Ho, 2, Wo, 2, Cin).mean(axis=(2, 4))
    ident = jnp.pad(ident, ((0, 0), (0, 0), (0, 0), (0, Co_p - Cin)))
    ident = ident.reshape(N, Ho * Wo, Co_p).astype(jnp.float32)

    # ---- kernel 2: conv2 + bn2 + relu + conv3 + bn3 + residual + relu ----
    out = conv2_conv3_residual(hq, w2, b2, w3, b3, ident, taps=taps, Ho=Ho, Wo=Wo)
    out = out[:, :, :c_out].reshape(N, Ho, Wo, c_out)
    return jnp.transpose(out, (0, 3, 1, 2))                            # back to NCHW


# ---------------------------------------------------------------------------
# Pure-JAX reference (f32, HIGHEST precision) for correctness check.
# ---------------------------------------------------------------------------
def reference_forward(x, p, stride):
    def conv(z, w, b, s=1, pad=0):
        y = jax.lax.conv_general_dilated(
            z, w, (s, s), ((pad, pad), (pad, pad)),
            dimension_numbers=("NCHW", "OIHW", "NCHW"),
            precision=jax.lax.Precision.HIGHEST)
        return y + b[None, :, None, None]

    def bn(z, g, be, m, v, eps=1e-5):
        sc = g / jnp.sqrt(v + eps)
        return (z - m[None, :, None, None]) * sc[None, :, None, None] + be[None, :, None, None]

    relu = lambda z: jnp.maximum(z, 0.0)
    out = relu(bn(conv(x, p["w1"], p["b1"]), p["g1"], p["be1"], p["m1"], p["v1"]))
    out = relu(bn(conv(out, p["w2"], p["b2"], s=stride, pad=1),
                  p["g2"], p["be2"], p["m2"], p["v2"]))
    out = bn(conv(out, p["w3"], p["b3"]), p["g3"], p["be3"], p["m3"], p["v3"])
    Cin, Cout = x.shape[1], out.shape[1]
    ident = x
    if stride == 2:
        n, c, h, w = ident.shape
        ident = ident.reshape(n, c, h // 2, 2, w // 2, 2).mean(axis=(3, 5))
    if Cout > Cin:
        ident = jnp.pad(ident, ((0, 0), (0, Cout - Cin), (0, 0), (0, 0)))
    return relu(out + ident)


# ---------------------------------------------------------------------------
# Deterministic synthetic parameters + demo run.
# ---------------------------------------------------------------------------
def make_params(key, n_in, planes):
    n_out = planes * 4
    ks = jax.random.split(key, 12)

    def nrm(k, shape, s=0.2):
        return s * jax.random.normal(k, shape, jnp.float32)

    return {
        # conv1: 1x1, n_in -> planes (Conv2d default bias=True)
        "w1": nrm(ks[0], (planes, n_in, 1, 1)),
        "b1": nrm(ks[1], (planes,), 0.05),
        "g1": 1.0 + nrm(ks[2], (planes,), 0.05),
        "be1": nrm(ks[2], (planes,), 0.05),
        "m1": nrm(ks[3], (planes,), 0.1),
        "v1": 0.5 + jnp.abs(nrm(ks[3], (planes,), 0.2)),
        # conv2: 3x3, stride, pad=1 (conv3x3 helper: bias=False)
        "w2": nrm(ks[4], (planes, planes, 3, 3)),
        "b2": jnp.zeros((planes,), jnp.float32),
        "g2": 1.0 + nrm(ks[5], (planes,), 0.05),
        "be2": nrm(ks[5], (planes,), 0.05),
        "m2": nrm(ks[6], (planes,), 0.1),
        "v2": 0.5 + jnp.abs(nrm(ks[6], (planes,), 0.2)),
        # conv3: 1x1, planes -> 4*planes
        "w3": nrm(ks[7], (n_out, planes, 1, 1)),
        "b3": nrm(ks[8], (n_out,), 0.05),
        "g3": 1.0 + nrm(ks[9], (n_out,), 0.05),
        "be3": nrm(ks[9], (n_out,), 0.05),
        "m3": nrm(ks[10], (n_out,), 0.1),
        "v3": 0.5 + jnp.abs(nrm(ks[10], (n_out,), 0.2)),
    }


if __name__ == "__main__":
    key = jax.random.PRNGKey(0)
    kx, kp = jax.random.split(key)

    N, Cin, H, W = 2, 8, 16, 16
    planes = 4          # n_out_planes
    stride = 2          # exercises the downsample + increase-planes identity
    Cout = planes * 4

    params = make_params(kp, Cin, planes)
    x = jax.random.normal(kx, (N, Cin, H, W), jnp.float32)

    prep = prepare_weights(params)          # BN folding hoisted out of forward
    out = bottleneck_forward(x, prep, stride=stride, c_out=Cout)
    out = jax.block_until_ready(out)

    assert out.shape == (N, Cout, H // stride, W // stride), out.shape

    ref = reference_forward(x, params, stride)
    err = float(jnp.max(jnp.abs(out - ref)))
    scale = float(jnp.max(jnp.abs(ref)))
    # bf16 matmul inputs (f32 accumulation) vs f32-HIGHEST reference.
    if err > 3e-2 * (1.0 + scale):
        raise SystemExit(f"max abs error too large: {err} (ref max {scale})")

    print("KERNEL_OK")
</pallas_src>

<mosaic_0001>
module attributes {stable_mosaic.version = 11 : i64} {
  func.func @_conv1_kernel(%arg0: i32, %arg1: memref<256x128xbf16, #tpu.memory_space<vmem>>, %arg2: memref<128x128xbf16, #tpu.memory_space<vmem>>, %arg3: memref<1x128xf32, #tpu.memory_space<vmem>>, %arg4: memref<256x128xbf16, #tpu.memory_space<vmem>>) attributes {dimension_semantics = [#tpu.dimension_semantics<parallel>], iteration_bounds = array<i64: 2>, scalar_prefetch = 0 : i64, scratch_operands = 0 : i64, tpu.core_type = #tpu.core_type<tc>, window_params = [{transform_indices = @transform_0, window_bounds = array<i64: 256, 128>}, {pipeline_mode = #tpu.pipeline_mode<synchronous>, transform_indices = @transform_1, window_bounds = array<i64: 128, 128>}, {pipeline_mode = #tpu.pipeline_mode<synchronous>, transform_indices = @transform_2, window_bounds = array<i64: 1, 128>}, {transform_indices = @transform_3, window_bounds = array<i64: 256, 128>}]} {
    %c0 = arith.constant 0 : index
    %c0_0 = arith.constant 0 : index
    %0 = vector.load %arg1[%c0, %c0_0] : memref<256x128xbf16, #tpu.memory_space<vmem>>, vector<256x128xbf16>
    %c0_1 = arith.constant 0 : index
    %c0_2 = arith.constant 0 : index
    %1 = vector.load %arg2[%c0_1, %c0_2] : memref<128x128xbf16, #tpu.memory_space<vmem>>, vector<128x128xbf16>
    %cst = arith.constant dense<0.000000e+00> : vector<256x128xf32>
    %2 = tpu.matmul %0, %1, %cst {dimension_numbers = #tpu.dot_dimension_numbers<[1], [0], [0], [1], [0, 0, 1, 1], [], []>} : vector<256x128xbf16>, vector<128x128xbf16>, vector<256x128xf32> -> vector<256x128xf32>
    %c0_3 = arith.constant 0 : index
    %c0_4 = arith.constant 0 : index
    %3 = vector.load %arg3[%c0_3, %c0_4] : memref<1x128xf32, #tpu.memory_space<vmem>>, vector<1x128xf32>
    %4 = vector.broadcast %3 : vector<1x128xf32> to vector<256x128xf32>
    %5 = arith.addf %2, %4 : vector<256x128xf32>
    %cst_5 = arith.constant 0.000000e+00 : f32
    %6 = vector.broadcast %cst_5 : f32 to vector<256x128xf32>
    %7 = arith.maximumf %5, %6 : vector<256x128xf32>
    %8 = arith.truncf %7 : vector<256x128xf32> to vector<256x128xbf16>
    %c0_6 = arith.constant 0 : index
    %c0_7 = arith.constant 0 : index
    %9 = vector.load %arg4[%c0_6, %c0_7] : memref<256x128xbf16, #tpu.memory_space<vmem>>, vector<256x128xbf16>
    tpu.vector_store %arg4[%c0_6, %c0_7], %8 {strides = array<i32>} : memref<256x128xbf16, #tpu.memory_space<vmem>>, vector<256x128xbf16>,
    return
  }
  func.func @transform_0(%arg0: i32) -> (i32, i32) {
    %c0_i32 = arith.constant 0 : i32
    %c0_i32_0 = arith.constant 0 : i32
    return %arg0, %c0_i32 : i32, i32
  }
  func.func @transform_1(%arg0: i32) -> (i32, i32) {
    %c0_i32 = arith.constant 0 : i32
    %c0_i32_0 = arith.constant 0 : i32
    %c0_i32_1 = arith.constant 0 : i32
    return %c0_i32, %c0_i32_0 : i32, i32
  }
  func.func @transform_2(%arg0: i32) -> (i32, i32) {
    %c0_i32 = arith.constant 0 : i32
    %c0_i32_0 = arith.constant 0 : i32
    %c0_i32_1 = arith.constant 0 : i32
    return %c0_i32, %c0_i32_0 : i32, i32
  }
  func.func @transform_3(%arg0: i32) -> (i32, i32) {
    %c0_i32 = arith.constant 0 : i32
    %c0_i32_0 = arith.constant 0 : i32
    return %arg0, %c0_i32 : i32, i32
  }
}

module attributes {stable_mosaic.version = 11 : i64} {
  func.func @_block_kernel(%arg0: i32, %arg1: memref<1x4x9x9x128xbf16, #tpu.memory_space<vmem>>, %arg2: memref<9x128x128xbf16, #tpu.memory_space<vmem>>, %arg3: memref<1x128xf32, #tpu.memory_space<vmem>>, %arg4: memref<128x128xbf16, #tpu.memory_space<vmem>>, %arg5: memref<1x128xf32, #tpu.memory_space<vmem>>, %arg6: memref<1x64x128xf32, #tpu.memory_space<vmem>>, %arg7: memref<1x64x128xf32, #tpu.memory_space<vmem>>) attributes {dimension_semantics = [#tpu.dimension_semantics<parallel>], iteration_bounds = array<i64: 2>, scalar_prefetch = 0 : i64, scratch_operands = 0 : i64, tpu.core_type = #tpu.core_type<tc>, window_params = [{transform_indices = @transform_0, window_bounds = array<i64: 1, 4, 9, 9, 128>}, {pipeline_mode = #tpu.pipeline_mode<synchronous>, transform_indices = @transform_1, window_bounds = array<i64: 9, 128, 128>}, {pipeline_mode = #tpu.pipeline_mode<synchronous>, transform_indices = @transform_2, window_bounds = array<i64: 1, 128>}, {pipeline_mode = #tpu.pipeline_mode<synchronous>, transform_indices = @transform_3, window_bounds = array<i64: 128, 128>}, {pipeline_mode = #tpu.pipeline_mode<synchronous>, transform_indices = @transform_4, window_bounds = array<i64: 1, 128>}, {transform_indices = @transform_5, window_bounds = array<i64: 1, 64, 128>}, {transform_indices = @transform_6, window_bounds = array<i64: 1, 64, 128>}]} {
    %c0 = arith.constant 0 : index
    %c0_0 = arith.constant 0 : index
    %c0_1 = arith.constant 0 : index
    %c0_2 = arith.constant 0 : index
    %c0_3 = arith.constant 0 : index
    %0 = vector.load %arg1[%c0, %c0_0, %c0_1, %c0_2, %c0_3] : memref<1x4x9x9x128xbf16, #tpu.memory_space<vmem>>, vector<1x1x8x8x128xbf16>
    %1 = vector.shape_cast %0 : vector<1x1x8x8x128xbf16> to vector<8x8x128xbf16>
    %2 = vector.shape_cast %1 : vector<8x8x128xbf16> to vector<64x128xbf16>
    %c0_4 = arith.constant 0 : index
    %c0_5 = arith.constant 0 : index
    %c0_6 = arith.constant 0 : index
    %3 = vector.load %arg2[%c0_4, %c0_5, %c0_6] : memref<9x128x128xbf16, #tpu.memory_space<vmem>>, vector<1x128x128xbf16>
    %4 = vector.shape_cast %3 : vector<1x128x128xbf16> to vector<128x128xbf16>
    %cst = arith.constant dense<0.000000e+00> : vector<64x128xf32>
    %5 = tpu.matmul %2, %4, %cst {dimension_numbers = #tpu.dot_dimension_numbers<[1], [0], [0], [1], [0, 0, 1, 1], [], []>} : vector<64x128xbf16>, vector<128x128xbf16>, vector<64x128xf32> -> vector<64x128xf32>
    %c0_7 = arith.constant 0 : index
    %c1 = arith.constant 1 : index
    %c0_8 = arith.constant 0 : index
    %c0_9 = arith.constant 0 : index
    %c0_10 = arith.constant 0 : index
    %6 = vector.load %arg1[%c0_7, %c1, %c0_8, %c0_9, %c0_10] : memref<1x4x9x9x128xbf16, #tpu.memory_space<vmem>>, vector<1x1x8x8x128xbf16>
    %7 = vector.shape_cast %6 : vector<1x1x8x8x128xbf16> to vector<8x8x128xbf16>
    %8 = vector.shape_cast %7 : vector<8x8x128xbf16> to vector<64x128xbf16>
    %c1_11 = arith.constant 1 : index
    %c0_12 = arith.constant 0 : index
    %c0_13 = arith.constant 0 : index
    %9 = vector.load %arg2[%c1_11, %c0_12, %c0_13] : memref<9x128x128xbf16, #tpu.memory_space<vmem>>, vector<1x128x128xbf16>
    %10 = vector.shape_cast %9 : vector<1x128x128xbf16> to vector<128x128xbf16>
    %cst_14 = arith.constant dense<0.000000e+00> : vector<64x128xf32>
    %11 = tpu.matmul %8, %10, %cst_14 {dimension_numbers = #tpu.dot_dimension_numbers<[1], [0], [0], [1], [0, 0, 1, 1], [], []>} : vector<64x128xbf16>, vector<128x128xbf16>, vector<64x128xf32> -> vector<64x128xf32>
    %12 = arith.addf %5, %11 : vector<64x128xf32>
    %c0_15 = arith.constant 0 : index
    %c0_16 = arith.constant 0 : index
    %c0_17 = arith.constant 0 : index
    %c1_18 = arith.constant 1 : index
    %c0_19 = arith.constant 0 : index
    %13 = vector.load %arg1[%c0_15, %c0_16, %c0_17, %c1_18, %c0_19] : memref<1x4x9x9x128xbf16, #tpu.memory_space<vmem>>, vector<1x1x8x8x128xbf16>
    %14 = vector.shape_cast %13 : vector<1x1x8x8x128xbf16> to vector<8x8x128xbf16>
    %15 = vector.shape_cast %14 : vector<8x8x128xbf16> to vector<64x128xbf16>
    %c2 = arith.constant 2 : index
    %c0_20 = arith.constant 0 : index
    %c0_21 = arith.constant 0 : index
    %16 = vector.load %arg2[%c2, %c0_20, %c0_21] : memref<9x128x128xbf16, #tpu.memory_space<vmem>>, vector<1x128x128xbf16>
    %17 = vector.shape_cast %16 : vector<1x128x128xbf16> to vector<128x128xbf16>
    %cst_22 = arith.constant dense<0.000000e+00> : vector<64x128xf32>
    %18 = tpu.matmul %15, %17, %cst_22 {dimension_numbers = #tpu.dot_dimension_numbers<[1], [0], [0], [1], [0, 0, 1, 1], [], []>} : vector<64x128xbf16>, vector<128x128xbf16>, vector<64x128xf32> -> vector<64x128xf32>
    %19 = arith.addf %12, %18 : vector<64x128xf32>
    %c0_23 = arith.constant 0 : index
    %c2_24 = arith.constant 2 : index
    %c0_25 = arith.constant 0 : index
    %c0_26 = arith.constant 0 : index
    %c0_27 = arith.constant 0 : index
    %20 = vector.load %arg1[%c0_23, %c2_24, %c0_25, %c0_26, %c0_27] : memref<1x4x9x9x128xbf16, #tpu.memory_space<vmem>>, vector<1x1x8x8x128xbf16>
    %21 = vector.shape_cast %20 : vector<1x1x8x8x128xbf16> to vector<8x8x128xbf16>
    %22 = vector.shape_cast %21 : vector<8x8x128xbf16> to vector<64x128xbf16>
    %c3 = arith.constant 3 : index
    %c0_28 = arith.constant 0 : index
    %c0_29 = arith.constant 0 : index
    %23 = vector.load %arg2[%c3, %c0_28, %c0_29] : memref<9x128x128xbf16, #tpu.memory_space<vmem>>, vector<1x128x128xbf16>
    %24 = vector.shape_cast %23 : vector<1x128x128xbf16> to vector<128x128xbf16>
    %cst_30 = arith.constant dense<0.000000e+00> : vector<64x128xf32>
    %25 = tpu.matmul %22, %24, %cst_30 {dimension_numbers = #tpu.dot_dimension_numbers<[1], [0], [0], [1], [0, 0, 1, 1], [], []>} : vector<64x128xbf16>, vector<128x128xbf16>, vector<64x128xf32> -> vector<64x128xf32>
    %26 = arith.addf %19, %25 : vector<64x128xf32>
    %c0_31 = arith.constant 0 : index
    %c3_32 = arith.constant 3 : index
    %c0_33 = arith.constant 0 : index
    %c0_34 = arith.constant 0 : index
    %c0_35 = arith.constant 0 : index
    %27 = vector.load %arg1[%c0_31, %c3_32, %c0_33, %c0_34, %c0_35] : memref<1x4x9x9x128xbf16, #tpu.memory_space<vmem>>, vector<1x1x8x8x128xbf16>
    %28 = vector.shape_cast %27 : vector<1x1x8x8x128xbf16> to vector<8x8x128xbf16>
    %29 = vector.shape_cast %28 : vector<8x8x128xbf16> to vector<64x128xbf16>
    %c4 = arith.constant 4 : index
    %c0_36 = arith.constant 0 : index
    %c0_37 = arith.constant 0 : index
    %30 = vector.load %arg2[%c4, %c0_36, %c0_37] : memref<9x128x128xbf16, #tpu.memory_space<vmem>>, vector<1x128x128xbf16>
    %31 = vector.shape_cast %30 : vector<1x128x128xbf16> to vector<128x128xbf16>
    %cst_38 = arith.constant dense<0.000000e+00> : vector<64x128xf32>
    %32 = tpu.matmul %29, %31, %cst_38 {dimension_numbers = #tpu.dot_dimension_numbers<[1], [0], [0], [1], [0, 0, 1, 1], [], []>} : vector<64x128xbf16>, vector<128x128xbf16>, vector<64x128xf32> -> vector<64x128xf32>
    %33 = arith.addf %26, %32 : vector<64x128xf32>
    %c0_39 = arith.constant 0 : index
    %c2_40 = arith.constant 2 : index
    %c0_41 = arith.constant 0 : index
    %c1_42 = arith.constant 1 : index
    %c0_43 = arith.constant 0 : index
    %34 = vector.load %arg1[%c0_39, %c2_40, %c0_41, %c1_42, %c0_43] : memref<1x4x9x9x128xbf16, #tpu.memory_space<vmem>>, vector<1x1x8x8x128xbf16>
    %35 = vector.shape_cast %34 : vector<1x1x8x8x128xbf16> to vector<8x8x128xbf16>
    %36 = vector.shape_cast %35 : vector<8x8x128xbf16> to vector<64x128xbf16>
    %c5 = arith.constant 5 : index
    %c0_44 = arith.constant 0 : index
    %c0_45 = arith.constant 0 : index
    %37 = vector.load %arg2[%c5, %c0_44, %c0_45] : memref<9x128x128xbf16, #tpu.memory_space<vmem>>, vector<1x128x128xbf16>
    %38 = vector.shape_cast %37 : vector<1x128x128xbf16> to vector<128x128xbf16>
    %cst_46 = arith.constant dense<0.000000e+00> : vector<64x128xf32>
    %39 = tpu.matmul %36, %38, %cst_46 {dimension_numbers = #tpu.dot_dimension_numbers<[1], [0], [0], [1], [0, 0, 1, 1], [], []>} : vector<64x128xbf16>, vector<128x128xbf16>, vector<64x128xf32> -> vector<64x128xf32>
    %40 = arith.addf %33, %39 : vector<64x128xf32>
    %c0_47 = arith.constant 0 : index
    %c0_48 = arith.constant 0 : index
    %c1_49 = arith.constant 1 : index
    %c0_50 = arith.constant 0 : index
    %c0_51 = arith.constant 0 : index
    %41 = vector.load %arg1[%c0_47, %c0_48, %c1_49, %c0_50, %c0_51] : memref<1x4x9x9x128xbf16, #tpu.memory_space<vmem>>, vector<1x1x8x8x128xbf16>
    %42 = vector.shape_cast %41 : vector<1x1x8x8x128xbf16> to vector<8x8x128xbf16>
    %43 = vector.shape_cast %42 : vector<8x8x128xbf16> to vector<64x128xbf16>
    %c6 = arith.constant 6 : index
    %c0_52 = arith.constant 0 : index
    %c0_53 = arith.constant 0 : index
    %44 = vector.load %arg2[%c6, %c0_52, %c0_53] : memref<9x128x128xbf16, #tpu.memory_space<vmem>>, vector<1x128x128xbf16>
    %45 = vector.shape_cast %44 : vector<1x128x128xbf16> to vector<128x128xbf16>
    %cst_54 = arith.constant dense<0.000000e+00> : vector<64x128xf32>
    %46 = tpu.matmul %43, %45, %cst_54 {dimension_numbers = #tpu.dot_dimension_numbers<[1], [0], [0], [1], [0, 0, 1, 1], [], []>} : vector<64x128xbf16>, vector<128x128xbf16>, vector<64x128xf32> -> vector<64x128xf32>
    %47 = arith.addf %40, %46 : vector<64x128xf32>
    %c0_55 = arith.constant 0 : index
    %c1_56 = arith.constant 1 : index
    %c1_57 = arith.constant 1 : index
    %c0_58 = arith.constant 0 : index
    %c0_59 = arith.constant 0 : index
    %48 = vector.load %arg1[%c0_55, %c1_56, %c1_57, %c0_58, %c0_59] : memref<1x4x9x9x128xbf16, #tpu.memory_space<vmem>>, vector<1x1x8x8x128xbf16>
    %49 = vector.shape_cast %48 : vector<1x1x8x8x128xbf16> to vector<8x8x128xbf16>
    %50 = vector.shape_cast %49 : vector<8x8x128xbf16> to vector<64x128xbf16>
    %c7 = arith.constant 7 : index
    %c0_60 = arith.constant 0 : index
    %c0_61 = arith.constant 0 : index
    %51 = vector.load %arg2[%c7, %c0_60, %c0_61] : memref<9x128x128xbf16, #tpu.memory_space<vmem>>, vector<1x128x128xbf16>
    %52 = vector.shape_cast %51 : vector<1x128x128xbf16> to vector<128x128xbf16>
    %cst_62 = arith.constant dense<0.000000e+00> : vector<64x128xf32>
    %53 = tpu.matmul %50, %52, %cst_62 {dimension_numbers = #tpu.dot_dimension_numbers<[1], [0], [0], [1], [0, 0, 1, 1], [], []>} : vector<64x128xbf16>, vector<128x128xbf16>, vector<64x128xf32> -> vector<64x128xf32>
    %54 = arith.addf %47, %53 : vector<64x128xf32>
    %c0_63 = arith.constant 0 : index
    %c0_64 = arith.constant 0 : index
    %c1_65 = arith.constant 1 : index
    %c1_66 = arith.constant 1 : index
    %c0_67 = arith.constant 0 : index
    %55 = vector.load %arg1[%c0_63, %c0_64, %c1_65, %c1_66, %c0_67] : memref<1x4x9x9x128xbf16, #tpu.memory_space<vmem>>, vector<1x1x8x8x128xbf16>
    %56 = vector.shape_cast %55 : vector<1x1x8x8x128xbf16> to vector<8x8x128xbf16>
    %57 = vector.shape_cast %56 : vector<8x8x128xbf16> to vector<64x128xbf16>
    %c8 = arith.constant 8 : index
    %c0_68 = arith.constant 0 : index
    %c0_69 = arith.constant 0 : index
    %58 = vector.load %arg2[%c8, %c0_68, %c0_69] : memref<9x128x128xbf16, #tpu.memory_space<vmem>>, vector<1x128x128xbf16>
    %59 = vector.shape_cast %58 : vector<1x128x128xbf16> to vector<128x128xbf16>
    %cst_70 = arith.constant dense<0.000000e+00> : vector<64x128xf32>
    %60 = tpu.matmul %57, %59, %cst_70 {dimension_numbers = #tpu.dot_dimension_numbers<[1], [0], [0], [1], [0, 0, 1, 1], [], []>} : vector<64x128xbf16>, vector<128x128xbf16>, vector<64x128xf32> -> vector<64x128xf32>
    %61 = arith.addf %54, %60 : vector<64x128xf32>
    %c0_71 = arith.constant 0 : index
    %c0_72 = arith.constant 0 : index
    %62 = vector.load %arg3[%c0_71, %c0_72] : memref<1x128xf32, #tpu.memory_space<vmem>>, vector<1x128xf32>
    %63 = vector.broadcast %62 : vector<1x128xf32> to vector<64x128xf32>
    %64 = arith.addf %61, %63 : vector<64x128xf32>
    %cst_73 = arith.constant 0.000000e+00 : f32
    %65 = vector.broadcast %cst_73 : f32 to vector<64x128xf32>
    %66 = arith.maximumf %64, %65 : vector<64x128xf32>
    %67 = arith.truncf %66 : vector<64x128xf32> to vector<64x128xbf16>
    %c0_74 = arith.constant 0 : index
    %c0_75 = arith.constant 0 : index
    %68 = vector.load %arg4[%c0_74, %c0_75] : memref<128x128xbf16, #tpu.memory_space<vmem>>, vector<128x128xbf16>
    %cst_76 = arith.constant dense<0.000000e+00> : vector<64x128xf32>
    %69 = tpu.matmul %67, %68, %cst_76 {dimension_numbers = #tpu.dot_dimension_numbers<[1], [0], [0], [1], [0, 0, 1, 1], [], []>} : vector<64x128xbf16>, vector<128x128xbf16>, vector<64x128xf32> -> vector<64x128xf32>
    %c0_77 = arith.constant 0 : index
    %c0_78 = arith.constant 0 : index
    %70 = vector.load %arg5[%c0_77, %c0_78] : memref<1x128xf32, #tpu.memory_space<vmem>>, vector<1x128xf32>
    %71 = vector.broadcast %70 : vector<1x128xf32> to vector<64x128xf32>
    %72 = arith.addf %69, %71 : vector<64x128xf32>
    %c0_79 = arith.constant 0 : index
    %c0_80 = arith.constant 0 : index
    %c0_81 = arith.constant 0 : index
    %73 = vector.load %arg6[%c0_79, %c0_80, %c0_81] : memref<1x64x128xf32, #tpu.memory_space<vmem>>, vector<1x64x128xf32>
    %74 = vector.shape_cast %73 : vector<1x64x128xf32> to vector<64x128xf32>
    %75 = arith.addf %72, %74 : vector<64x128xf32>
    %cst_82 = arith.constant 0.000000e+00 : f32
    %76 = vector.broadcast %cst_82 : f32 to vector<64x128xf32>
    %77 = arith.maximumf %75, %76 : vector<64x128xf32>
    %c0_83 = arith.constant 0 : index
    %c0_84 = arith.constant 0 : index
    %c0_85 = arith.constant 0 : index
    %78 = vector.load %arg7[%c0_83, %c0_84, %c0_85] : memref<1x64x128xf32, #tpu.memory_space<vmem>>, vector<1x64x128xf32>
    %79 = vector.shape_cast %78 : vector<1x64x128xf32> to vector<64x128xf32>
    %80 = vector.shape_cast %77 : vector<64x128xf32> to vector<1x64x128xf32>
    tpu.vector_store %arg7[%c0_83, %c0_84, %c0_85], %80 {strides = array<i32>} : memref<1x64x128xf32, #tpu.memory_space<vmem>>, vector<1x64x128xf32>,
    return
  }
  func.func @transform_0(%arg0: i32) -> (i32, i32, i32, i32, i32) {
    %c0_i32 = arith.constant 0 : i32
    %c0_i32_0 = arith.constant 0 : i32
    %c0_i32_1 = arith.constant 0 : i32
    %c0_i32_2 = arith.constant 0 : i32
    %c0_i32_3 = arith.constant 0 : i32
    return %arg0, %c0_i32, %c0_i32_0, %c0_i32_1, %c0_i32_2 : i32, i32, i32, i32, i32
  }
  func.func @transform_1(%arg0: i32) -> (i32, i32, i32) {
    %c0_i32 = arith.constant 0 : i32
    %c0_i32_0 = arith.constant 0 : i32
    %c0_i32_1 = arith.constant 0 : i32
    %c0_i32_2 = arith.constant 0 : i32
    return %c0_i32, %c0_i32_0, %c0_i32_1 : i32, i32, i32
  }
  func.func @transform_2(%arg0: i32) -> (i32, i32) {
    %c0_i32 = arith.constant 0 : i32
    %c0_i32_0 = arith.constant 0 : i32
    %c0_i32_1 = arith.constant 0 : i32
    return %c0_i32, %c0_i32_0 : i32, i32
  }
  func.func @transform_3(%arg0: i32) -> (i32, i32) {
    %c0_i32 = arith.constant 0 : i32
    %c0_i32_0 = arith.constant 0 : i32
    %c0_i32_1 = arith.constant 0 : i32
    return %c0_i32, %c0_i32_0 : i32, i32
  }
  func.func @transform_4(%arg0: i32) -> (i32, i32) {
    %c0_i32 = arith.constant 0 : i32
    %c0_i32_0 = arith.constant 0 : i32
    %c0_i32_1 = arith.constant 0 : i32
    return %c0_i32, %c0_i32_0 : i32, i32
  }
  func.func @transform_5(%arg0: i32) -> (i32, i32, i32) {
    %c0_i32 = arith.constant 0 : i32
    %c0_i32_0 = arith.constant 0 : i32
    %c0_i32_1 = arith.constant 0 : i32
    return %arg0, %c0_i32, %c0_i32_0 : i32, i32, i32
  }
  func.func @transform_6(%arg0: i32) -> (i32, i32, i32) {
    %c0_i32 = arith.constant 0 : i32
    %c0_i32_0 = arith.constant 0 : i32
    %c0_i32_1 = arith.constant 0 : i32
    return %arg0, %c0_i32, %c0_i32_0 : i32, i32, i32
  }
}

</mosaic_0001>

<bundles_post_ra>
// kernel: bottleneck_forward.2
= control target key start
LH: loop header
LB: loop body
LE: loop exit
PB: predicated region body
PF: predicated region fallthrough
CT: control target
= control target key end

     0   :  { %s1126_s12 = smov 0   ;;  %s1247_s0 = inlined_call_operand.vmem [shape: bf16[512,128], index: 0, kind: input, shape index: {}]   ;;  %s1248_s1 = inlined_call_operand.vmem [shape: bf16[128,128], index: 1, kind: input, shape index: {}]   ;;  %s1249_s2 = inlined_call_operand.vmem [shape: f32[1,128], index: 2, kind: input, shape index: {}]   ;;  %s1250_s3 = inlined_call_operand.vmem [shape: bf16[512,128], index: 3, kind: output, shape index: {}]  }
   0x1 LB: > { %s783_s13 = sadd.s32 4294967295, %s1104_s12   ;;  %p787_p0 = scmp.ge.s32.totalorder %s1104_s12, 1  ;;  %s1104_s12 = sphi %s1126_s12, %s13_s12  }
   0x2   : > { %p138_p1 = scmp.lt.s32.totalorder %s1104_s12, 3 }
   0x4   : > { %p139_p2 = pnand %p787_p0, %p138_p1 }
   0x5   : > { %v1074_v0 = vld [vmem:[%s1248_s1] sm:$0xff] (!%p139_p2)   ;;  %s788_s16 = sshll.u32 (!%p139_p2), %s783_s13, 5  ;;  %v1075_v1 = vld [vmem:[%s1248_s1 + $0x8] sm:$0xff] (!%p139_p2)   ;;  %v1076_v2 = vld [vmem:[%s1248_s1 + $0x10] sm:$0xff] (!%p139_p2)  }
   0x6   : > { %142 = sbr.rel (%p139_p2) target bundleno = 284 (0x11c), region = 32  ;;  %p163_p3 = scmp.lt.s32.totalorder (!%p139_p2), %s788_s16, 63  ;;  %1002 = vmatprep.subr.bf16.mxu0 (!%p139_p2), %v1074_v0  ;;  %1050 = vmatprep.subr.bf16.mxu1 (!%p139_p2), %v1074_v0  ;;  %v1077_v3 = vld [vmem:[%s1248_s1 + $0x18] sm:$0xff] (!%p139_p2)   ;;  %v1078_v6 = vld [vmem:[%s1248_s1 + $0x20] sm:$0xff] (!%p139_p2)   ;;  %v1079_v7 = vld [vmem:[%s1248_s1 + $0x28] sm:$0xff] (!%p139_p2)  }
   0x7   : > { %1003 = vmatpush3.bf16.msra.mxu0 (!%p139_p2), %v1074_v0  ;;  %1058 = vmatpush3.bf16.msra.mxu1 (!%p139_p2), %v1074_v0  ;;  %v1080_v8 = vld [vmem:[%s1248_s1 + $0x30] sm:$0xff] (!%p139_p2)   ;;  %v1081_v9 = vld [vmem:[%s1248_s1 + $0x38] sm:$0xff] (!%p139_p2)   ;;  %v1187_v24 = vld [vmem:[%s1249_s2] ss:$0 sm:$0xff] (!%p139_p2) }
   0x8   : > { %1004 = vmatprep.subr.bf16.mxu0 (!%p139_p2), %v1075_v1  ;;  %1051 = vmatprep.subr.bf16.mxu1 (!%p139_p2), %v1075_v1 }
   0xb   : > { %1005 = vmatpush3.bf16.msra.mxu0 (!%p139_p2), %v1075_v1  ;;  %1059 = vmatpush3.bf16.msra.mxu1 (!%p139_p2), %v1075_v1 }
   0xc   : > { %1006 = vmatprep.subr.bf16.mxu0 (!%p139_p2), %v1076_v2  ;;  %1052 = vmatprep.subr.bf16.mxu1 (!%p139_p2), %v1076_v2 }
   0xd   : > { %s1252_s16 = smov (!%p163_p3, %s788_s16), 63 }
   0xe   : > { %s789_s21 = sshll.u32 %s1252_s16, 2 }
   0xf   : > { %s1151_s24 = scalar_lea.vmem %s1247_s0, %s789_s21  ;;  %1007 = vmatpush3.bf16.msra.mxu0 %v1076_v2  ;;  %1060 = vmatpush3.bf16.msra.mxu1 %v1076_v2  ;;  %s1202_s13 = scalar_lea.vmem %s1250_s3, %s789_s21 }
  0x10   : > { %v1082_v4 = vld [vmem:[%s1151_s24] sm:$0xff]   ;;  %1008 = vmatprep.subr.bf16.mxu0 %v1077_v3  ;;  %1053 = vmatprep.subr.bf16.mxu1 %v1077_v3  ;;  %v1084_v10 = vld [vmem:[%s1151_s24 + $0x8] sm:$0xff]   ;;  %v1086_v12 = vld [vmem:[%s1151_s24 + $0x10] sm:$0xff]  }
  0x11   : > { %v1083_v5 = vld [vmem:[%s1151_s24 + $0x40] sm:$0xff]   ;;  %1018 = vmatprep.mubr.bf16.mxu0 %v1082_v4  ;;  %v1085_v11 = vld [vmem:[%s1151_s24 + $0x48] sm:$0xff]   ;;  %v1087_v13 = vld [vmem:[%s1151_s24 + $0x50] sm:$0xff]  }
  0x12   : > { %1034 = vmatprep.mubr.bf16.mxu1 %v1083_v5  ;;  %v1088_v14 = vld [vmem:[%s1151_s24 + $0x18] sm:$0xff]   ;;  %v1090_v16 = vld [vmem:[%s1151_s24 + $0x20] sm:$0xff]   ;;  %v1092_v18 = vld [vmem:[%s1151_s24 + $0x28] sm:$0xff]  }
  0x13   : > { %1009 = vmatpush3.bf16.msra.mxu0 %v1077_v3  ;;  %1061 = vmatpush3.bf16.msra.mxu1 %v1077_v3  ;;  %v1089_v15 = vld [vmem:[%s1151_s24 + $0x58] sm:$0xff]   ;;  %v1091_v17 = vld [vmem:[%s1151_s24 + $0x60] sm:$0xff]   ;;  %v1093_v19 = vld [vmem:[%s1151_s24 + $0x68] sm:$0xff]  }
  0x14   : > { %1010 = vmatprep.subr.bf16.mxu0 %v1078_v6  ;;  %1054 = vmatprep.subr.bf16.mxu1 %v1078_v6  ;;  %v1094_v20 = vld [vmem:[%s1151_s24 + $0x30] sm:$0xff]   ;;  %v1096_v22 = vld [vmem:[%s1151_s24 + $0x38] sm:$0xff]  }
  0x15   : > { %v1095_v21 = vld [vmem:[%s1151_s24 + $0x70] sm:$0xff]   ;;  %v1097_v23 = vld [vmem:[%s1151_s24 + $0x78] sm:$0xff]  }
  0x17   : > { %1011 = vmatpush3.bf16.msra.mxu0 %v1078_v6  ;;  %1062 = vmatpush3.bf16.msra.mxu1 %v1078_v6 }
  0x18   : > { %1012 = vmatprep.subr.bf16.mxu0 %v1079_v7  ;;  %1055 = vmatprep.subr.bf16.mxu1 %v1079_v7 }
  0x1b   : > { %1013 = vmatpush3.bf16.msra.mxu0 %v1079_v7  ;;  %1063 = vmatpush3.bf16.msra.mxu1 %v1079_v7 }
  0x1c   : > { %1014 = vmatprep.subr.bf16.mxu0 %v1080_v8  ;;  %1056 = vmatprep.subr.bf16.mxu1 %v1080_v8 }
  0x1f   : > { %1015 = vmatpush3.bf16.msra.mxu0 %v1080_v8  ;;  %1064 = vmatpush3.bf16.msra.mxu1 %v1080_v8 }
  0x20   : > { %1016 = vmatprep.subr.bf16.mxu0 %v1081_v9  ;;  %1057 = vmatprep.subr.bf16.mxu1 %v1081_v9 }
  0x23   : > { %1017 = vmatpush3.bf16.msra.mxu0 %v1081_v9  ;;  %1065 = vmatpush3.bf16.msra.mxu1 %v1081_v9 }
  0x26   : > { %1019 = vmatmul.mubr.bf16.vlgmr.msra.gmra.mrb[0].mxu0 %v1084_v10  ;;  %1035 = vmatmul.mubr.bf16.vlgmr.msra.gmra.mrb[0].mxu1 %v1085_v11 }
  0x27   : > { %1022 = vmatprep.mubr.bf16.mxu0 %v1086_v12  ;;  %1038 = vmatprep.mubr.bf16.mxu1 %v1087_v13 }
  0x2e   : > { %1023 = vmatmul.mubr.bf16.gmra.mrb[4].mxu0 %v1088_v14  ;;  %1039 = vmatmul.mubr.bf16.gmra.mrb[4].mxu1 %v1089_v15 }
  0x2f   : > { %1026 = vmatprep.mubr.bf16.mxu0 %v1090_v16  ;;  %1042 = vmatprep.mubr.bf16.mxu1 %v1091_v17 }
  0x36   : > { %1027 = vmatmul.mubr.bf16.gmra.mrb[8].mxu0 %v1092_v18  ;;  %1043 = vmatmul.mubr.bf16.gmra.mrb[8].mxu1 %v1093_v19 }
  0x37   : > { %1030 = vmatprep.mubr.bf16.mxu0 %v1094_v20  ;;  %1046 = vmatprep.mubr.bf16.mxu1 %v1095_v21 }
  0x3e   : > { %1031 = vmatmul.mubr.bf16.gmra.mrb[12].mxu0 %v1096_v22  ;;  %1047 = vmatmul.mubr.bf16.gmra.mrb[12].mxu1 %v1097_v23 }
  0xf9   : > { %v1020_v25 = vpop.f32.mrb[0].mxu0  ;;  %v1036_v26 = vpop.f32.mrb[0].mxu1 }
  0xfa   : > { %v417_v27 = vadd.f32 %v1020_v25, %v1187_v24  ;;  %v481_v28 = vadd.f32 %v1036_v26, %v1187_v24  ;;  %v408_v29 = vpop.f32.mrb[1].mxu0  ;;  %v472_v30 = vpop.f32.mrb[1].mxu1 }
  0xfb   : > { %v409_v31 = vadd.f32 %v1187_v24, %v408_v29  ;;  %v473_v32 = vadd.f32 %v1187_v24, %v472_v30  ;;  %v1021_v33 = vpop.f32.mrb[2].mxu0  ;;  %v1037_v34 = vpop.f32.mrb[2].mxu1 }
  0xfc   : > { %v420_v35 = vadd.f32 %v1021_v33, %v1187_v24  ;;  %v484_v36 = vadd.f32 %v1037_v34, %v1187_v24  ;;  %v411_v37 = vpop.f32.mrb[3].mxu0  ;;  %v475_v38 = vpop.f32.mrb[3].mxu1  ;;  %v537_v41 = vmax.f32 %v417_v27, 0.0  ;;  %v553_v42 = vmax.f32 %v481_v28, 0.0 }
  0xfd   : > { %v412_v39 = vadd.f32 %v1187_v24, %v411_v37  ;;  %v476_v40 = vadd.f32 %v1187_v24, %v475_v38  ;;  %v535_v45 = vmax.f32 %v409_v31, 0.0  ;;  %v551_v46 = vmax.f32 %v473_v32, 0.0 }
  0xfe   : > { %v538_v43 = vmax.f32 %v420_v35, 0.0  ;;  %v554_v44 = vmax.f32 %v484_v36, 0.0 }
  0xff   : > { %v536_v47 = vmax.f32 %v412_v39, 0.0  ;;  %v552_v48 = vmax.f32 %v476_v40, 0.0 }
 0x100   : > { %v891_v49 = vpack.c.bf16 %v538_v43, %v537_v41  ;;  %v931_v50 = vpack.c.bf16 %v554_v44, %v553_v42 }
 0x101   : > { %v886_v51 = vpack.c.bf16 %v536_v47, %v535_v45  ;;  %v926_v52 = vpack.c.bf16 %v552_v48, %v551_v46  ;;  %v1024_v53 = vpop.f32.mrb[4].mxu0  ;;  %v1040_v54 = vpop.f32.mrb[4].mxu1 }
 0x102   : > { %963 = vst [vmem:[%s1202_s13 + $0x8] sm:$0xff] %v891_v49   ;;  %971 = vst [vmem:[%s1202_s13 + $0x48] sm:$0xff] %v931_v50   ;;  %v433_v55 = vadd.f32 %v1024_v53, %v1187_v24  ;;  %v497_v56 = vadd.f32 %v1040_v54, %v1187_v24  ;;  %v424_v57 = vpop.f32.mrb[5].mxu0  ;;  %v488_v58 = vpop.f32.mrb[5].mxu1 }
 0x103   : > { %887 = vst [vmem:[%s1202_s13] sm:$0xff] %v886_v51   ;;  %970 = vst [vmem:[%s1202_s13 + $0x40] sm:$0xff] %v926_v52   ;;  %v425_v59 = vadd.f32 %v1187_v24, %v424_v57  ;;  %v489_v60 = vadd.f32 %v1187_v24, %v488_v58  ;;  %v1025_v61 = vpop.f32.mrb[6].mxu0  ;;  %v1041_v62 = vpop.f32.mrb[6].mxu1 }
 0x104   : > { %v436_v63 = vadd.f32 %v1025_v61, %v1187_v24  ;;  %v500_v0 = vadd.f32 %v1041_v62, %v1187_v24  ;;  %v427_v1 = vpop.f32.mrb[7].mxu0  ;;  %v491_v2 = vpop.f32.mrb[7].mxu1  ;;  %v541_v5 = vmax.f32 %v433_v55, 0.0  ;;  %v557_v6 = vmax.f32 %v497_v56, 0.0 }
 0x105   : > { %v428_v3 = vadd.f32 %v1187_v24, %v427_v1  ;;  %v492_v4 = vadd.f32 %v1187_v24, %v491_v2  ;;  %v539_v9 = vmax.f32 %v425_v59, 0.0  ;;  %v555_v10 = vmax.f32 %v489_v60, 0.0 }
 0x106   : > { %v542_v7 = vmax.f32 %v436_v63, 0.0  ;;  %v558_v8 = vmax.f32 %v500_v0, 0.0 }
 0x107   : > { %v540_v11 = vmax.f32 %v428_v3, 0.0  ;;  %v556_v12 = vmax.f32 %v492_v4, 0.0 }
 0x108   : > { %v901_v13 = vpack.c.bf16 %v542_v7, %v541_v5  ;;  %v941_v14 = vpack.c.bf16 %v558_v8, %v557_v6 }
 0x109   : > { %v896_v15 = vpack.c.bf16 %v540_v11, %v539_v9  ;;  %v936_v16 = vpack.c.bf16 %v556_v12, %v555_v10  ;;  %v1028_v17 = vpop.f32.mrb[8].mxu0  ;;  %v1044_v18 = vpop.f32.mrb[8].mxu1 }
 0x10a   : > { %965 = vst [vmem:[%s1202_s13 + $0x18] sm:$0xff] %v901_v13   ;;  %973 = vst [vmem:[%s1202_s13 + $0x58] sm:$0xff] %v941_v14   ;;  %v449_v19 = vadd.f32 %v1028_v17, %v1187_v24  ;;  %v513_v20 = vadd.f32 %v1044_v18, %v1187_v24  ;;  %v440_v21 = vpop.f32.mrb[9].mxu0  ;;  %v504_v22 = vpop.f32.mrb[9].mxu1 }
 0x10b   : > { %964 = vst [vmem:[%s1202_s13 + $0x10] sm:$0xff] %v896_v15   ;;  %972 = vst [vmem:[%s1202_s13 + $0x50] sm:$0xff] %v936_v16   ;;  %v441_v23 = vadd.f32 %v1187_v24, %v440_v21  ;;  %v505_v25 = vadd.f32 %v1187_v24, %v504_v22  ;;  %v1029_v26 = vpop.f32.mrb[10].mxu0  ;;  %v1045_v27 = vpop.f32.mrb[10].mxu1 }
 0x10c   : > { %v452_v28 = vadd.f32 %v1029_v26, %v1187_v24  ;;  %v516_v29 = vadd.f32 %v1045_v27, %v1187_v24  ;;  %v443_v30 = vpop.f32.mrb[11].mxu0  ;;  %v507_v31 = vpop.f32.mrb[11].mxu1  ;;  %v545_v34 = vmax.f32 %v449_v19, 0.0  ;;  %v561_v35 = vmax.f32 %v513_v20, 0.0 }
 0x10d   : > { %v444_v32 = vadd.f32 %v1187_v24, %v443_v30  ;;  %v508_v33 = vadd.f32 %v1187_v24, %v507_v31  ;;  %v543_v38 = vmax.f32 %v441_v23, 0.0  ;;  %v559_v39 = vmax.f32 %v505_v25, 0.0 }
 0x10e   : > { %v546_v36 = vmax.f32 %v452_v28, 0.0  ;;  %v562_v37 = vmax.f32 %v516_v29, 0.0 }
 0x10f   : > { %v544_v40 = vmax.f32 %v444_v32, 0.0  ;;  %v560_v41 = vmax.f32 %v508_v33, 0.0 }
 0x110   : > { %v911_v42 = vpack.c.bf16 %v546_v36, %v545_v34  ;;  %v951_v43 = vpack.c.bf16 %v562_v37, %v561_v35 }
 0x111   : > { %v906_v44 = vpack.c.bf16 %v544_v40, %v543_v38  ;;  %v946_v45 = vpack.c.bf16 %v560_v41, %v559_v39  ;;  %v1032_v46 = vpop.f32.mrb[12].mxu0  ;;  %v1048_v47 = vpop.f32.mrb[12].mxu1 }
 0x112   : > { %967 = vst [vmem:[%s1202_s13 + $0x28] sm:$0xff] %v911_v42   ;;  %975 = vst [vmem:[%s1202_s13 + $0x68] sm:$0xff] %v951_v43   ;;  %v465_v48 = vadd.f32 %v1032_v46, %v1187_v24  ;;  %v529_v49 = vadd.f32 %v1048_v47, %v1187_v24  ;;  %v456_v50 = vpop.f32.mrb[13].mxu0  ;;  %v520_v51 = vpop.f32.mrb[13].mxu1 }
 0x113   : > { %966 = vst [vmem:[%s1202_s13 + $0x20] sm:$0xff] %v906_v44   ;;  %974 = vst [vmem:[%s1202_s13 + $0x60] sm:$0xff] %v946_v45   ;;  %v457_v52 = vadd.f32 %v1187_v24, %v456_v50  ;;  %v521_v53 = vadd.f32 %v1187_v24, %v520_v51  ;;  %v1033_v54 = vpop.f32.mrb[14].mxu0  ;;  %v1049_v55 = vpop.f32.mrb[14].mxu1 }
 0x114   : > { %v468_v56 = vadd.f32 %v1033_v54, %v1187_v24  ;;  %v532_v57 = vadd.f32 %v1049_v55, %v1187_v24  ;;  %v459_v58 = vpop.f32.mrb[15].mxu0  ;;  %v523_v59 = vpop.f32.mrb[15].mxu1  ;;  %v549_v62 = vmax.f32 %v465_v48, 0.0  ;;  %v565_v63 = vmax.f32 %v529_v49, 0.0 }
 0x115   : > { %v460_v60 = vadd.f32 %v1187_v24, %v459_v58  ;;  %v524_v61 = vadd.f32 %v1187_v24, %v523_v59  ;;  %v547_v2 = vmax.f32 %v457_v52, 0.0  ;;  %v563_v3 = vmax.f32 %v521_v53, 0.0 }
 0x116   : > { %v550_v0 = vmax.f32 %v468_v56, 0.0  ;;  %v566_v1 = vmax.f32 %v532_v57, 0.0 }
 0x117   : > { %v548_v4 = vmax.f32 %v460_v60, 0.0  ;;  %v564_v5 = vmax.f32 %v524_v61, 0.0 }
 0x118   : > { %v921_v6 = vpack.c.bf16 %v550_v0, %v549_v62  ;;  %v961_v7 = vpack.c.bf16 %v566_v1, %v565_v63 }
 0x119   : > { %v916_v8 = vpack.c.bf16 %v548_v4, %v547_v2  ;;  %v956_v9 = vpack.c.bf16 %v564_v5, %v563_v3 }
 0x11a   : > { %969 = vst [vmem:[%s1202_s13 + $0x38] sm:$0xff] %v921_v6   ;;  %977 = vst [vmem:[%s1202_s13 + $0x78] sm:$0xff] %v961_v7  }
 0x11b   : > { %968 = vst [vmem:[%s1202_s13 + $0x30] sm:$0xff] %v916_v8   ;;  %976 = vst [vmem:[%s1202_s13 + $0x70] sm:$0xff] %v956_v9  }
 0x11c PF: > { %s13_s12 = sadd.s32 1, %s1104_s12  }
 0x11d   : > { %p10_p4 = scmp.ge.s32.totalorder %s13_s12, 4  }
 0x11f   :  { %12 = sbr.rel (!%p10_p4) target bundleno = 1 (0x1), region = 62 }

// kernel: bottleneck_forward.3
= control target key start
LH: loop header
LB: loop body
LE: loop exit
PB: predicated region body
PF: predicated region fallthrough
CT: control target
= control target key end

     0   :  { %s3304_s21 = smov 0   ;;  %s3722_s0 = inlined_call_operand.vmem [shape: bf16[2,4,9,9,128], index: 0, kind: input, shape index: {}]   ;;  %s3723_s1 = inlined_call_operand.vmem [shape: bf16[9,128,128], index: 1, kind: input, shape index: {}]   ;;  %s3724_s2 = inlined_call_operand.vmem [shape: f32[1,128], index: 2, kind: input, shape index: {}]   ;;  %s3725_s3 = inlined_call_operand.vmem [shape: bf16[128,128], index: 3, kind: input, shape index: {}]   ;;  %s3726_s4 = inlined_call_operand.vmem [shape: f32[1,128], index: 4, kind: input, shape index: {}]   ;;  %s3727_s5 = inlined_call_operand.vmem [shape: f32[2,64,128], index: 5, kind: input, shape index: {}]   ;;  %s3728_s6 = inlined_call_operand.vmem [shape: f32[2,64,128], index: 6, kind: output, shape index: {}]  }
   0x1 LB: > { %s2392_s22 = sadd.s32 4294967295, %s3267_s21   ;;  %p2396_p0 = scmp.ge.s32.totalorder %s3267_s21, 1  ;;  %s3267_s21 = sphi %s3304_s21, %s16_s21  }
   0x2   : > { %p222_p1 = scmp.lt.s32.totalorder %s3267_s21, 3 }
   0x4   : > { %p223_p2 = pnand %p2396_p0, %p222_p1 }
   0x5   : > { %v3157_v0 = vld [vmem:[%s3723_s1 + $0x40] sm:$0xff] (!%p223_p2)   ;;  %p257_p3 = scmp.lt.s32.totalorder (!%p223_p2), %s2392_s22, 1  ;;  %v3159_v2 = vld [vmem:[%s3723_s1 + $0x48] sm:$0xff] (!%p223_p2)   ;;  %v3161_v4 = vld [vmem:[%s3723_s1 + $0x50] sm:$0xff] (!%p223_p2)   ;;  %vm613_vm0 = vsmask.f32 (!%p223_p2), 3328 }
   0x6   : > { %226 = sbr.rel (%p223_p2) target bundleno = 621 (0x26d), region = 44  ;;  %v3158_v1 = vld [vmem:[%s3723_s1 + $0x100] sm:$0xff] (!%p223_p2)   ;;  %2844 = vmatprep.subr.bf16.mxu1 (!%p223_p2), %v3157_v0  ;;  %v3160_v3 = vld [vmem:[%s3723_s1 + $0x108] sm:$0xff] (!%p223_p2)   ;;  %v3162_v5 = vld [vmem:[%s3723_s1 + $0x110] sm:$0xff] (!%p223_p2)   ;;  %vm614_vm1 = vsmask.f32 (!%p223_p2), 7440 }
   0x7   : > { %2940 = vmatprep.subr.bf16.mxu0 (!%p223_p2), %v3158_v1  ;;  %2845 = vmatpush3.bf16.msra.mxu1 (!%p223_p2), %v3157_v0  ;;  %v3163_v6 = vld [vmem:[%s3723_s1 + $0x58] sm:$0xff] (!%p223_p2)   ;;  %v3165_v8 = vld [vmem:[%s3723_s1 + $0x60] sm:$0xff] (!%p223_p2)   ;;  %v3167_v10 = vld [vmem:[%s3723_s1 + $0x68] sm:$0xff] (!%p223_p2)  }
   0x8   : > { %2941 = vmatpush3.bf16.msra.mxu0 (!%p223_p2), %v3158_v1  ;;  %2846 = vmatprep.subr.bf16.mxu1 (!%p223_p2), %v3159_v2  ;;  %v3164_v7 = vld [vmem:[%s3723_s1 + $0x118] sm:$0xff] (!%p223_p2)   ;;  %v3166_v9 = vld [vmem:[%s3723_s1 + $0x120] sm:$0xff] (!%p223_p2)   ;;  %v3168_v12 = vld [vmem:[%s3723_s1 + $0x128] sm:$0xff] (!%p223_p2)  }
   0x9   : > { %2942 = vmatprep.subr.bf16.mxu0 (!%p223_p2), %v3160_v3  ;;  %v3169_v14 = vld [vmem:[%s3723_s1 + $0x70] sm:$0xff] (!%p223_p2)   ;;  %v3171_v16 = vld [vmem:[%s3723_s1 + $0x78] sm:$0xff] (!%p223_p2)   ;;  %v3174_v18 = vld [vmem:[%s3723_s1] sm:$0xff] (!%p223_p2)  }
   0xa   : > { %v3170_v15 = vld [vmem:[%s3723_s1 + $0x130] sm:$0xff] (!%p223_p2)   ;;  %v3172_v17 = vld [vmem:[%s3723_s1 + $0x138] sm:$0xff] (!%p223_p2)   ;;  %v3176_v19 = vld [vmem:[%s3723_s1 + $0x140] sm:$0xff] (!%p223_p2)  }
   0xb   : > { %2847 = vmatpush3.bf16.msra.mxu1 (!%p223_p2), %v3159_v2  ;;  %v3179_v22 = vld [vmem:[%s3723_s1 + $0x8] sm:$0xff] (!%p223_p2)   ;;  %v3181_v26 = vld [vmem:[%s3723_s1 + $0x10] sm:$0xff] (!%p223_p2)   ;;  %v3183_v28 = vld [vmem:[%s3723_s1 + $0x18] sm:$0xff] (!%p223_p2)  }
   0xc   : > { %2943 = vmatpush3.bf16.msra.mxu0 (!%p223_p2), %v3160_v3  ;;  %2848 = vmatprep.subr.bf16.mxu1 (!%p223_p2), %v3161_v4  ;;  %v3180_v23 = vld [vmem:[%s3723_s1 + $0x148] sm:$0xff] (!%p223_p2)   ;;  %v3182_v27 = vld [vmem:[%s3723_s1 + $0x150] sm:$0xff] (!%p223_p2)   ;;  %v3184_v31 = vld [vmem:[%s3723_s1 + $0x158] sm:$0xff] (!%p223_p2)  }
   0xd   : > { %s3732_s22 = smov (!%p257_p3, %s2392_s22), 1  ;;  %2944 = vmatprep.subr.bf16.mxu0 %v3162_v5  ;;  %v3185_v38 = vld [vmem:[%s3723_s1 + $0x20] sm:$0xff]   ;;  %v3187_v47 = vld [vmem:[%s3723_s1 + $0x28] sm:$0xff]   ;;  %vm3419_vm2 = vmor %vm613_vm0, %vm614_vm1 }
   0xe   : > { %s3148_s15 = smul.u32 288, %s3732_s22  ;;  %v3186_v43 = vld [vmem:[%s3723_s1 + $0x160] sm:$0xff]   ;;  %v3188_v50 = vld [vmem:[%s3723_s1 + $0x168] sm:$0xff]   ;;  %v3190_v2 = vld [vmem:[%s3723_s1 + $0x30] sm:$0xff]   ;;  %s2722_s16 = sshll.u32 %s3732_s22, 6 }
   0xf   : > { %2849 = vmatpush3.bf16.msra.mxu1 %v3161_v4  ;;  %v3256_v53 = vld [vmem:[%s3725_s3 + $0x18] sm:$0xff]   ;;  %s3693_s19 = scalar_lea.vmem %s3727_s5, %s2722_s16  ;;  %s3705_s25 = scalar_lea.vmem %s3728_s6, %s2722_s16 }
  0x10   : > { %2945 = vmatpush3.bf16.msra.mxu0 %v3162_v5  ;;  %2850 = vmatprep.subr.bf16.mxu1 %v3163_v6  ;;  %s3348_s24 = scalar_lea.vmem %s3722_s0, %s3148_s15 }
  0x11   : > { %2946 = vmatprep.subr.bf16.mxu0 %v3164_v7  ;;  %v3173_v11 = vld [vmem:[%s3348_s24 + $0x48] ss:$8 sps:$4 sm:$0xff]   ;;  %v3175_v13 = vld [vmem:[%s3348_s24 + $0xd8] ss:$8 sps:$4 sm:$0xff]   ;;  %v2551_v34 = vld [vmem:[%s3348_s24 + $0x94] sm:$0x1] }
  0x12   : > { %2860 = vmatprep.mubr.bf16.mxu1 %v3173_v11  ;;  %2956 = vmatprep.mubr.bf16.mxu0 %v3175_v13  ;;  %v3177_v20 = vld [vmem:[%s3348_s24 + $0x58] ss:$8 sps:$4 sm:$0xff]   ;;  %v3178_v21 = vld [vmem:[%s3348_s24 + $0xe8] ss:$8 sps:$4 sm:$0xff]   ;;  %v2553_v39 = vld [vmem:[%s3348_s24 + $0x9c] sm:$0x1] }
  0x13   : > { %2851 = vmatpush3.bf16.msra.mxu1 %v3163_v6  ;;  %v3189_v24 = vld [vmem:[%s3348_s24 + $0x68] ss:$8 sps:$4 sm:$0xff]   ;;  %v3191_v25 = vld [vmem:[%s3348_s24 + $0xf8] ss:$8 sps:$4 sm:$0xff]   ;;  %v1250_v40 = vshll.u32 %v2551_v34, 16  ;;  %v1264_v46 = vshll.u32 %v2553_v39, 16 }
  0x14   : > { %2947 = vmatpush3.bf16.msra.mxu0 %v3164_v7  ;;  %2852 = vmatprep.subr.bf16.mxu1 %v3165_v8  ;;  %v3193_v29 = vld [vmem:[%s3348_s24 + $0x78] ss:$8 sps:$4 sm:$0xff]   ;;  %v3194_v30 = vld [vmem:[%s3348_s24 + $0x108] ss:$8 sps:$4 sm:$0xff]   ;;  %v2555_v57 = vld [vmem:[%s3348_s24 + $0xa4] sm:$0x1] }
  0x15   : > { %2948 = vmatprep.subr.bf16.mxu0 %v3166_v9  ;;  %v3197_v32 = vld [vmem:[%s3348_s24] ss:$8 sps:$4 sm:$0xff]   ;;  %v2550_v33 = vld [vmem:[%s3348_s24 + $0x90] sm:$0xf]  ;;  %v2552_v35 = vld [vmem:[%s3348_s24 + $0x98] sm:$0xf] }
  0x16   : > { %v1241_v36 = vshrl.u32 %v2550_v33, 16  ;;  %v1244_v37 = vshll.u32 %v2550_v33, 16  ;;  %v1255_v41 = vshrl.u32 %v2552_v35, 16  ;;  %v1258_v42 = vshll.u32 %v2552_v35, 16  ;;  %v2554_v56 = vld [vmem:[%s3348_s24 + $0xa0] sm:$0xf] }
  0x17   : > { %2853 = vmatpush3.bf16.msra.mxu1 %v3165_v8  ;;  %v1252_v52 = vrot.slane %v1250_v40, 5  ;;  %v1266_v55 = vrot.slane %v1264_v46, 5  ;;  %v2556_v59 = vld [vmem:[%s3348_s24 + $0xa8] sm:$0xf]  ;;  %v2557_v60 = vld [vmem:[%s3348_s24 + $0xac] sm:$0x1] }
  0x18   : > { %2949 = vmatpush3.bf16.msra.mxu0 %v3166_v9  ;;  %2854 = vmatprep.subr.bf16.mxu1 %v3167_v10  ;;  %v1243_v44 = vrot.slane %v1241_v36, 4  ;;  %v1246_v45 = vrot.slane %v1244_v37, 5  ;;  %v1257_v48 = vrot.slane %v1255_v41, 4  ;;  %v1260_v49 = vrot.slane %v1258_v42, 5  ;;  %v3192_v6 = vld [vmem:[%s3723_s1 + $0x170] sm:$0xff]  }
  0x19   : > { %2950 = vmatprep.subr.bf16.mxu0 %v3168_v12  ;;  %v1269_v61 = vshrl.u32 %v2554_v56, 16  ;;  %v1272_v63 = vshll.u32 %v2554_v56, 16  ;;  %v1278_v0 = vshll.u32 %v2555_v57, 16  ;;  %v1283_v1 = vshrl.u32 %v2556_v59, 16  ;;  %v3211_v37 = vld [vmem:[%s3348_s24 + $0x20] ss:$8 sps:$4 sm:$0xff]  }
  0x1a   : > { %v1247_v51 = vor.u32 %v1246_v45, %v1243_v44  ;;  %v1261_v54 = vor.u32 %v1260_v49, %v1257_v48  ;;  %v1286_v5 = vshll.u32 %v2556_v59, 16  ;;  %v3214_v48 = vld [vmem:[%s3348_s24 + $0x30] ss:$8 sps:$4 sm:$0xff]   ;;  %v2562_v49 = vld [vmem:[%s3348_s24 + $0xc0] sm:$0xf] }
  0x1b   : > { %2855 = vmatpush3.bf16.msra.mxu1 %v3167_v10  ;;  %v1271_v4 = vrot.slane %v1269_v61, 4  ;;  %v1274_v8 = vrot.slane %v1272_v63, 5  ;;  %v1285_v9 = vrot.slane %v1283_v1, 4  ;;  %v1292_v10 = vshll.u32 %v2557_v60, 16  ;;  %v3205_v59 = vld [vmem:[%s3723_s1 + $0x98] sm:$0xff]  }
  0x1c   : > { %2951 = vmatpush3.bf16.msra.mxu0 %v3168_v12  ;;  %2856 = vmatprep.subr.bf16.mxu1 %v3169_v14  ;;  %v1248_v58 = vrot.slane %v1247_v51, 4  ;;  %v1262_v62 = vrot.slane %v1261_v54, 4  ;;  %v1280_v12 = vrot.slane %v1278_v0, 5  ;;  %v1288_v13 = vrot.slane %v1286_v5, 5  ;;  %v2564_v51 = vld [vmem:[%s3348_s24 + $0xc8] sm:$0xf] }
  0x1d   : > { %2952 = vmatprep.subr.bf16.mxu0 %v3170_v15  ;;  %v1325_v56 = vshrl.u32 %v2562_v49, 16  ;;  %v1328_v57 = vshll.u32 %v2562_v49, 16  ;;  %v1339_v61 = vshrl.u32 %v2564_v51, 16 }
  0x1e   : > { %v1253_v3 = vsel %vm3419_vm2, %v1248_v58, %v1252_v52  ;;  %v1267_v7 = vsel %vm3419_vm2, %v1262_v62, %v1266_v55  ;;  %v3204_v52 = vld [vmem:[%s3723_s1 + $0x190] sm:$0xff]   ;;  %v2565_v55 = vld [vmem:[%s3348_s24 + $0xcc] sm:$0x1]  ;;  %v1342_v62 = vshll.u32 %v2564_v51, 16 }
  0x1f   : > { %2857 = vmatpush3.bf16.msra.mxu1 %v3169_v14  ;;  %v2582_v11 = vcombine.low %v1253_v3, %v1267_v7  ;;  %v3195_v14 = vld [vmem:[%s3723_s1 + $0x38] sm:$0xff]   ;;  %v1348_v63 = vshll.u32 %v2565_v55, 16  ;;  %v1327_v1 = vrot.slane %v1325_v56, 4 }
  0x20   : > { %2953 = vmatpush3.bf16.msra.mxu0 %v3170_v15  ;;  %2858 = vmatprep.subr.bf16.mxu1 %v3171_v16  ;;  %v1275_v15 = vor.u32 %v1274_v8, %v1271_v4  ;;  %v3206_v4 = vld [vmem:[%s3723_s1 + $0x198] sm:$0xff]   ;;  %v1344_v7 = vrot.slane %v1342_v62, 5 }
  0x21   : > { %2954 = vmatprep.subr.bf16.mxu0 %v3172_v17  ;;  %v1350_v8 = vrot.slane %v1348_v63, 5 }
  0x23   : > { %2859 = vmatpush3.bf16.msra.mxu1 %v3171_v16  ;;  %v1289_v16 = vor.u32 %v1288_v13, %v1285_v9  ;;  %v3207_v13 = vld [vmem:[%s3723_s1 + $0xa0] sm:$0xff]  }
  0x24   : > { %2955 = vmatpush3.bf16.msra.mxu0 %v3172_v17  ;;  %2868 = vmatprep.subr.bf16.mxu1 %v3174_v18  ;;  %v1276_v17 = vrot.slane %v1275_v15, 4 }
  0x25   : > { %2964 = vmatprep.subr.bf16.mxu0 %v3176_v19 }
  0x26   : > { %2861 = vmatmul.mubr.bf16.vlgmr.msra.gmra.mrb[0].mxu1 %v3177_v20  ;;  %v1290_v20 = vrot.slane %v1289_v16, 4  ;;  %v599_v16 = vld [vmem:[%s3348_s24 + $0x8] sm:$0xf] }
  0x27   : > { %2869 = vmatpush3.bf16.msra.mxu1 %v3174_v18  ;;  %2957 = vmatmul.mubr.bf16.vlgmr.msra.gmra.mrb[0].mxu0 %v3178_v21  ;;  %v1294_v18 = vrot.slane %v1292_v10, 5  ;;  %v3198_v21 = vld [vmem:[%s3723_s1 + $0x80] sm:$0xff]  }
  0x28   : > { %2965 = vmatpush3.bf16.msra.mxu0 %v3176_v19  ;;  %2870 = vmatprep.subr.bf16.mxu1 %v3179_v22  ;;  %v3196_v19 = vld [vmem:[%s3723_s1 + $0x178] sm:$0xff]  }
  0x29   : > { %2966 = vmatprep.subr.bf16.mxu0 %v3180_v23  ;;  %2864 = vmatprep.mubr.bf16.mxu1 %v3189_v24  ;;  %v3199_v24 = vld [vmem:[%s3723_s1 + $0x180] sm:$0xff]  }
  0x2a   : > { %2960 = vmatprep.mubr.bf16.mxu0 %v3191_v25  ;;  %v3200_v25 = vld [vmem:[%s3348_s24 + $0x10] ss:$8 sps:$4 sm:$0xff]  }
  0x2b   : > { %2871 = vmatpush3.bf16.msra.mxu1 %v3179_v22  ;;  %v1281_v22 = vsel %vm3419_vm2, %v1276_v17, %v1280_v12  ;;  %v598_v12 = vld [vmem:[%s3348_s24 + $0x4] sm:$0x1]  ;;  %v600_v17 = vld [vmem:[%s3348_s24 + $0xc] sm:$0x1] }
  0x2c   : > { %2967 = vmatpush3.bf16.msra.mxu0 %v3180_v23  ;;  %2872 = vmatprep.subr.bf16.mxu1 %v3181_v26  ;;  %v1295_v23 = vsel %vm3419_vm2, %v1290_v20, %v1294_v18 }
  0x2d   : > { %2968 = vmatprep.subr.bf16.mxu0 %v3182_v27 }
  0x2e   : > { %2865 = vmatmul.mubr.bf16.gmra.mrb[4].mxu1 %v3193_v29  ;;  %v3202_v29 = vld [vmem:[%s3723_s1 + $0x188] sm:$0xff]  }
  0x2f   : > { %2873 = vmatpush3.bf16.msra.mxu1 %v3181_v26  ;;  %2961 = vmatmul.mubr.bf16.gmra.mrb[4].mxu0 %v3194_v30  ;;  %v3201_v26 = vld [vmem:[%s3723_s1 + $0x88] sm:$0xff]   ;;  %v2559_v30 = vld [vmem:[%s3348_s24 + $0xb4] sm:$0x1] }
  0x30   : > { %2969 = vmatpush3.bf16.msra.mxu0 %v3182_v27  ;;  %2874 = vmatprep.subr.bf16.mxu1 %v3183_v28  ;;  %v2558_v27 = vld [vmem:[%s3348_s24 + $0xb0] sm:$0xf]  ;;  %v1306_v35 = vshll.u32 %v2559_v30, 16 }
  0x31   : > { %2970 = vmatprep.subr.bf16.mxu0 %v3184_v31  ;;  %2884 = vmatprep.mubr.bf16.mxu1 %v3197_v32  ;;  %v2561_v32 = vld [vmem:[%s3348_s24 + $0xbc] sm:$0x1]  ;;  %v1297_v33 = vshrl.u32 %v2558_v27, 16  ;;  %v1300_v34 = vshll.u32 %v2558_v27, 16  ;;  %v640_v27 = vshll.u32 %v600_v17, 16 }
  0x32   : > { %2980 = vmatprep.mubr.bf16.mxu0 %v2582_v11  ;;  %v1320_v39 = vshll.u32 %v2561_v32, 16  ;;  %v1308_v44 = vrot.slane %v1306_v35, 5  ;;  %v597_v11 = vld [vmem:[%s3348_s24] sm:$0xf]  ;;  %v3209_v32 = vld [vmem:[%s3723_s1 + $0xa8] sm:$0xff]  }
  0x33   : > { %2875 = vmatpush3.bf16.msra.mxu1 %v3183_v28  ;;  %v2583_v28 = vcombine.low %v1281_v22, %v1295_v23  ;;  %v1299_v40 = vrot.slane %v1297_v33, 4  ;;  %v1302_v41 = vrot.slane %v1300_v34, 5  ;;  %v617_v18 = vshrl.u32 %v597_v11, 16  ;;  %v608_v17 = vld [vmem:[%s3348_s24 + $0x2c] sm:$0x1] }
  0x34   : > { %2971 = vmatpush3.bf16.msra.mxu0 %v3184_v31  ;;  %2876 = vmatprep.subr.bf16.mxu1 %v3185_v38  ;;  %v2560_v31 = vld [vmem:[%s3348_s24 + $0xb8] sm:$0xf]  ;;  %v1322_v46 = vrot.slane %v1320_v39, 5  ;;  %v631_v22 = vshrl.u32 %v599_v16, 16  ;;  %v634_v23 = vshll.u32 %v599_v16, 16 }
  0x35   : > { %2972 = vmatprep.subr.bf16.mxu0 %v3186_v43  ;;  %v1311_v36 = vshrl.u32 %v2560_v31, 16  ;;  %v607_v16 = vld [vmem:[%s3348_s24 + $0x28] sm:$0xf] }
  0x36   : > { %v633_v30 = vrot.slane %v631_v22, 4  ;;  %v687_v22 = vshrl.u32 %v607_v16, 16 }
  0x37   : > { %2877 = vmatpush3.bf16.msra.mxu1 %v3185_v38  ;;  %v1314_v38 = vshll.u32 %v2560_v31, 16  ;;  %v1313_v42 = vrot.slane %v1311_v36, 4  ;;  %v636_v31 = vrot.slane %v634_v23, 5  ;;  %v642_v36 = vrot.slane %v640_v27, 5  ;;  %v609_v23 = vld [vmem:[%s3348_s24 + $0x30] sm:$0xf] }
  0x38   : > { %2973 = vmatpush3.bf16.msra.mxu0 %v3186_v43  ;;  %2878 = vmatprep.subr.bf16.mxu1 %v3187_v47  ;;  %v3203_v43 = vld [vmem:[%s3723_s1 + $0x90] sm:$0xff]   ;;  %v611_v27 = vld [vmem:[%s3348_s24 + $0x38] sm:$0xf] }
  0x39   : > { %2974 = vmatprep.subr.bf16.mxu0 %v3188_v50  ;;  %v1316_v45 = vrot.slane %v1314_v38, 5  ;;  %v3210_v38 = vld [vmem:[%s3723_s1 + $0x1a8] sm:$0xff]  }
  0x3b   : > { %2879 = vmatpush3.bf16.msra.mxu1 %v3187_v47  ;;  %v1303_v47 = vor.u32 %v1302_v41, %v1299_v40  ;;  %v1317_v54 = vor.u32 %v1316_v45, %v1313_v42  ;;  %v637_v40 = vor.u32 %v636_v31, %v633_v30  ;;  %v601_v41 = vld [vmem:[%s3348_s24 + $0x10] sm:$0xf]  ;;  %v689_v31 = vrot.slane %v687_v22, 4  ;;  %v3240_v22 = vld [vmem:[%s3723_s1 + $0x200] sm:$0xff]  }
  0x3c   : > { %2975 = vmatpush3.bf16.msra.mxu0 %v3188_v50  ;;  %2880 = vmatprep.subr.bf16.mxu1 %v3190_v2  ;;  %v2563_v50 = vld [vmem:[%s3348_s24 + $0xc4] sm:$0x1]  ;;  %v645_v45 = vshrl.u32 %v601_v41, 16 }
  0x3d   : > { %2976 = vmatprep.subr.bf16.mxu0 %v3192_v6  ;;  %v1334_v58 = vshll.u32 %v2563_v50, 16  ;;  %v1304_v60 = vrot.slane %v1303_v47, 4  ;;  %v1318_v0 = vrot.slane %v1317_v54, 4  ;;  %v604_v47 = vld [vmem:[%s3348_s24 + $0x1c] sm:$0x1] }
  0x3f   : > { %2881 = vmatpush3.bf16.msra.mxu1 %v3190_v2  ;;  %v1330_v2 = vrot.slane %v1328_v57, 5  ;;  %v1336_v3 = vrot.slane %v1334_v58, 5  ;;  %v1309_v5 = vsel %vm3419_vm2, %v1304_v60, %v1308_v44  ;;  %v1323_v9 = vsel %vm3419_vm2, %v1318_v0, %v1322_v46  ;;  %v603_v44 = vld [vmem:[%s3348_s24 + $0x18] sm:$0xf]  ;;  %v3213_v60 = vld [vmem:[%s3723_s1 + $0x1b0] sm:$0xff]  }
  0x40   : > { %2977 = vmatpush3.bf16.msra.mxu0 %v3192_v6  ;;  %2882 = vmatprep.subr.bf16.mxu1 %v3195_v14  ;;  %v1341_v6 = vrot.slane %v1339_v61, 4  ;;  %v638_v46 = vrot.slane %v637_v40, 4  ;;  %v659_v50 = vshrl.u32 %v603_v44, 16  ;;  %v662_v54 = vshll.u32 %v603_v44, 16 }
  0x41   : > { %2978 = vmatprep.subr.bf16.mxu0 %v3196_v19  ;;  %v1331_v10 = vor.u32 %v1330_v2, %v1327_v1  ;;  %v668_v58 = vshll.u32 %v604_v47, 16  ;;  %v715_v40 = vshrl.u32 %v611_v27, 16 }
  0x42   : > { %v1345_v15 = vor.u32 %v1344_v7, %v1341_v6  ;;  %v643_v55 = vsel %vm3419_vm2, %v638_v46, %v642_v36  ;;  %v661_v57 = vrot.slane %v659_v50, 4  ;;  %v664_v63 = vrot.slane %v662_v54, 5  ;;  %v3216_v6 = vld [vmem:[%s3723_s1 + $0x1b8] sm:$0xff]   ;;  %v3217_v7 = vld [vmem:[%s3723_s1 + $0xc0] sm:$0xff]  }
  0x43   : > { %2883 = vmatpush3.bf16.msra.mxu1 %v3195_v14  ;;  %v2584_v14 = vcombine.low %v1309_v5, %v1323_v9  ;;  %v1332_v20 = vrot.slane %v1331_v10, 4  ;;  %v3219_v10 = vld [vmem:[%s3723_s1 + $0x1c0] sm:$0xff]   ;;  %v704_v36 = vshll.u32 %v609_v23, 16 }
  0x44   : > { %2979 = vmatpush3.bf16.msra.mxu0 %v3196_v19  ;;  %2892 = vmatprep.subr.bf16.mxu1 %v3198_v21  ;;  %v620_v19 = vshll.u32 %v597_v11, 16  ;;  %v665_v1 = vor.u32 %v664_v63, %v661_v57  ;;  %v3220_v11 = vld [vmem:[%s3348_s24 + $0x18] ss:$8 sps:$4 sm:$0xff]  }
  0x45   : > { %2988 = vmatprep.subr.bf16.mxu0 %v3199_v24 }
  0x46   : > { %2885 = vmatmul.mubr.bf16.vlgmr.msra.gmra.mrb[0].mxu1 %v3200_v25  ;;  %v619_v25 = vrot.slane %v617_v18, 4  ;;  %v666_v5 = vrot.slane %v665_v1, 4  ;;  %v3222_v18 = vld [vmem:[%s3723_s1 + $0x1c8] sm:$0xff]   ;;  %v3227_v1 = vld [vmem:[%s3723_s1 + $0xe0] sm:$0xff]  }
  0x47   : > { %2893 = vmatpush3.bf16.msra.mxu1 %v3198_v21  ;;  %2981 = vmatmul.mubr.bf16.vlgmr.msra.gmra.mrb[0].mxu0 %v2583_v28  ;;  %v626_v21 = vshll.u32 %v598_v12, 16  ;;  %v3208_v28 = vld [vmem:[%s3723_s1 + $0x1a0] sm:$0xff]  }
  0x48   : > { %2989 = vmatpush3.bf16.msra.mxu0 %v3199_v24  ;;  %2894 = vmatprep.subr.bf16.mxu1 %v3201_v26  ;;  %v1346_v24 = vrot.slane %v1345_v15, 4  ;;  %v605_v12 = vld [vmem:[%s3348_s24 + $0x20] sm:$0xf]  ;;  %v606_v15 = vld [vmem:[%s3348_s24 + $0x24] sm:$0x1] }
  0x49   : > { %2990 = vmatprep.subr.bf16.mxu0 %v3202_v29  ;;  %2888 = vmatprep.mubr.bf16.mxu1 %v3211_v37  ;;  %v628_v35 = vrot.slane %v626_v21, 5  ;;  %v3218_v37 = vld [vmem:[%s3348_s24 + $0x8] ss:$8 sps:$4 sm:$0xff]   ;;  %v682_v21 = vshll.u32 %v606_v15, 16  ;;  %v2667_v15 = vld [vmem:[%s3348_s24 + $0xc] sm:$0x1] }
  0x4a   : > { %2984 = vmatprep.mubr.bf16.mxu0 %v2584_v14  ;;  %v1351_v33 = vsel %vm3419_vm2, %v1346_v24, %v1350_v8  ;;  %v3221_v14 = vld [vmem:[%s3723_s1 + $0xc8] sm:$0xff]   ;;  %v690_v24 = vshll.u32 %v607_v16, 16  ;;  %v2668_v16 = vld [vmem:[%s3348_s24 + $0x10] sm:$0xf] }
  0x4b   : > { %2895 = vmatpush3.bf16.msra.mxu1 %v3201_v26  ;;  %v622_v26 = vrot.slane %v620_v19, 5  ;;  %v673_v19 = vshrl.u32 %v605_v12, 16  ;;  %v684_v30 = vrot.slane %v682_v21, 5  ;;  %v1882_v21 = vshll.u32 %v2668_v16, 16 }
  0x4c   : > { %2991 = vmatpush3.bf16.msra.mxu0 %v3202_v29  ;;  %2896 = vmatprep.subr.bf16.mxu1 %v3203_v43  ;;  %v1337_v29 = vsel %vm3419_vm2, %v1332_v20, %v1336_v3  ;;  %v670_v3 = vrot.slane %v668_v58, 5  ;;  %v676_v20 = vshll.u32 %v605_v12, 16  ;;  %v3225_v58 = vld [vmem:[%s3723_s1 + $0xd8] sm:$0xff]  }
  0x4d   : > { %2992 = vmatprep.subr.bf16.mxu0 %v3204_v52  ;;  %v623_v34 = vor.u32 %v622_v26, %v619_v25  ;;  %v2585_v39 = vcombine.low %v1337_v29, %v1351_v33  ;;  %v696_v25 = vshll.u32 %v608_v17, 16  ;;  %v610_v26 = vld [vmem:[%s3348_s24 + $0x34] sm:$0x1]  ;;  %v692_v33 = vrot.slane %v690_v24, 5  ;;  %v3235_v12 = vld [vmem:[%s3723_s1 + $0xf8] sm:$0xff]  }
  0x4e   : > { %2889 = vmatmul.mubr.bf16.gmra.mrb[4].mxu1 %v3214_v48  ;;  %v648_v48 = vshll.u32 %v601_v41, 16  ;;  %v671_v9 = vsel %vm3419_vm2, %v666_v5, %v670_v3  ;;  %v678_v29 = vrot.slane %v676_v20, 5  ;;  %v718_v41 = vshll.u32 %v611_v27, 16  ;;  %v3228_v5 = vld [vmem:[%s3723_s1 + $0x1e0] sm:$0xff]   ;;  %v2669_v17 = vld [vmem:[%s3348_s24 + $0x14] sm:$0x1] }
  0x4f   : > { %2897 = vmatpush3.bf16.msra.mxu1 %v3203_v43  ;;  %v624_v42 = vrot.slane %v623_v34, 4  ;;  %v602_v43 = vld [vmem:[%s3348_s24 + $0x14] sm:$0x1]  ;;  %2985 = vmatmul.mubr.bf16.gmra.mrb[4].mxu0 %v2585_v39  ;;  %v698_v34 = vrot.slane %v696_v25, 5  ;;  %v710_v39 = vshll.u32 %v610_v26, 16  ;;  %v1879_v20 = vshrl.u32 %v2668_v16, 16 }
  0x50   : > { %2993 = vmatpush3.bf16.msra.mxu0 %v3204_v52  ;;  %2898 = vmatprep.subr.bf16.mxu1 %v3205_v59  ;;  %v654_v49 = vshll.u32 %v602_v43, 16  ;;  %v647_v52 = vrot.slane %v645_v45, 4  ;;  %v650_v56 = vrot.slane %v648_v48, 5  ;;  %v693_v43 = vor.u32 %v692_v33, %v689_v31  ;;  %v3238_v27 = vld [vmem:[%s3348_s24 + $0xa0] ss:$8 sps:$4 sm:$0xff]  }
  0x51   : > { %2994 = vmatprep.subr.bf16.mxu0 %v3206_v4  ;;  %v629_v51 = vsel %vm3419_vm2, %v624_v42, %v628_v35  ;;  %3004 = vmatprep.mubr.bf16.mxu0 %v3218_v37  ;;  %v701_v35 = vshrl.u32 %v609_v23, 16  ;;  %v3223_v37 = vld [vmem:[%s3723_s1 + $0xd0] sm:$0xff]   ;;  %v706_v45 = vrot.slane %v704_v36, 5  ;;  %v712_v48 = vrot.slane %v710_v39, 5 }
  0x52   : > { %v2466_v61 = vcombine.low %v629_v51, %v643_v55  ;;  %v656_v62 = vrot.slane %v654_v49, 5  ;;  %v651_v0 = vor.u32 %v650_v56, %v647_v52  ;;  %v3224_v42 = vld [vmem:[%s3723_s1 + $0x1d0] sm:$0xff]   ;;  %v717_v49 = vrot.slane %v715_v40, 4 }
  0x53   : > { %2899 = vmatpush3.bf16.msra.mxu1 %v3205_v59  ;;  %v3212_v59 = vld [vmem:[%s3723_s1 + $0xb0] sm:$0xff]   ;;  %v703_v44 = vrot.slane %v701_v35, 4  ;;  %v720_v50 = vrot.slane %v718_v41, 5  ;;  %v694_v51 = vrot.slane %v693_v43, 4  ;;  %v1874_v25 = vshll.u32 %v2667_v15, 16  ;;  %v3242_v35 = vld [vmem:[%s3723_s1 + $0x208] sm:$0xff]  }
  0x54   : > { %2995 = vmatpush3.bf16.msra.mxu0 %v3206_v4  ;;  %2900 = vmatprep.subr.bf16.mxu1 %v3207_v13  ;;  %v652_v2 = vrot.slane %v651_v0, 4  ;;  %v3215_v4 = vld [vmem:[%s3723_s1 + $0xb8] sm:$0xff]   ;;  %v3232_v55 = vld [vmem:[%s3348_s24 + $0x28] ss:$8 sps:$4 sm:$0xff]   ;;  %v1888_v26 = vshll.u32 %v2669_v17, 16 }
  0x55   : > { %2996 = vmatprep.subr.bf16.mxu0 %v3208_v28  ;;  %2908 = vmatprep.mubr.bf16.mxu1 %v2466_v61  ;;  %v707_v52 = vor.u32 %v706_v45, %v703_v44  ;;  %v721_v57 = vor.u32 %v720_v50, %v717_v49  ;;  %v3234_v61 = vld [vmem:[%s3348_s24 + $0x38] ss:$8 sps:$4 sm:$0xff]   ;;  %v3245_v40 = vld [vmem:[%s3723_s1 + $0x210] sm:$0xff]   ;;  %v2674_v49 = vld [vmem:[%s3348_s24 + $0x28] sm:$0xf] }
  0x56   : > { %v657_v8 = vsel %vm3419_vm2, %v652_v2, %v656_v62  ;;  %v3226_v62 = vld [vmem:[%s3723_s1 + $0x1d8] sm:$0xff]   ;;  %v3244_v43 = vld [vmem:[%s3348_s24 + $0xc0] ss:$8 sps:$4 sm:$0xff]  }
  0x57   : > { %2901 = vmatpush3.bf16.msra.mxu1 %v3207_v13  ;;  %v2467_v13 = vcombine.low %v657_v8, %v671_v9  ;;  %v722_v0 = vrot.slane %v721_v57, 4  ;;  %v3229_v8 = vld [vmem:[%s3723_s1 + $0xe8] sm:$0xff]   ;;  %v3243_v31 = vld [vmem:[%s3348_s24 + $0xb0] ss:$8 sps:$4 sm:$0xff]   ;;  %v1921_v57 = vshrl.u32 %v2674_v49, 16 }
  0x58   : > { %2997 = vmatpush3.bf16.msra.mxu0 %v3208_v28  ;;  %2902 = vmatprep.subr.bf16.mxu1 %v3209_v32  ;;  %v675_v28 = vrot.slane %v673_v19, 4  ;;  %v3230_v9 = vld [vmem:[%s3723_s1 + $0x1e8] sm:$0xff]   ;;  %v3249_v33 = vld [vmem:[%s3348_s24 + $0x70] ss:$8 sps:$4 sm:$0xff]  }
  0x59   : > { %2998 = vmatprep.subr.bf16.mxu0 %v3210_v38  ;;  %v3250_v44 = vld [vmem:[%s3348_s24 + $0x80] ss:$8 sps:$4 sm:$0xff]   ;;  %v2670_v45 = vld [vmem:[%s3348_s24 + $0x18] sm:$0xf] }
  0x5a   : > { %v1893_v50 = vshrl.u32 %v2670_v45, 16 }
  0x5b   : > { %2903 = vmatpush3.bf16.msra.mxu1 %v3209_v32  ;;  %v612_v32 = vld [vmem:[%s3348_s24 + $0x3c] sm:$0x1] }
  0x5c   : > { %2999 = vmatpush3.bf16.msra.mxu0 %v3210_v38  ;;  %2904 = vmatprep.subr.bf16.mxu1 %v3212_v59  ;;  %v679_v38 = vor.u32 %v678_v29, %v675_v28  ;;  %v724_v46 = vshll.u32 %v612_v32, 16  ;;  %v1881_v28 = vrot.slane %v1879_v20, 4  ;;  %v1884_v29 = vrot.slane %v1882_v21, 5  ;;  %v3251_v20 = vld [vmem:[%s3723_s1 + $0x230] sm:$0xff]  }
  0x5d   : > { %3000 = vmatprep.subr.bf16.mxu0 %v3213_v60 }
  0x5e   : > { %v680_v47 = vrot.slane %v679_v38, 4  ;;  %v726_v54 = vrot.slane %v724_v46, 5  ;;  %v1890_v38 = vrot.slane %v1888_v26, 5 }
  0x5f   : > { %2905 = vmatpush3.bf16.msra.mxu1 %v3212_v59  ;;  %v699_v59 = vsel %vm3419_vm2, %v694_v51, %v698_v34  ;;  %v1885_v34 = vor.u32 %v1884_v29, %v1881_v28  ;;  %v1896_v51 = vshll.u32 %v2670_v45, 16 }
  0x60   : > { %3001 = vmatpush3.bf16.msra.mxu0 %v3213_v60  ;;  %2906 = vmatprep.subr.bf16.mxu1 %v3215_v4  ;;  %v685_v56 = vsel %vm3419_vm2, %v680_v47, %v684_v30  ;;  %v708_v60 = vrot.slane %v707_v52, 4  ;;  %v727_v3 = vsel %vm3419_vm2, %v722_v0, %v726_v54  ;;  %v3241_v30 = vld [vmem:[%s3348_s24 + $0x60] ss:$8 sps:$4 sm:$0xff]   ;;  %v2676_v52 = vld [vmem:[%s3348_s24 + $0x30] sm:$0xf] }
  0x61   : > { %3002 = vmatprep.subr.bf16.mxu0 %v3216_v6  ;;  %v2468_v63 = vcombine.low %v685_v56, %v699_v59  ;;  %v1886_v39 = vrot.slane %v1885_v34, 4  ;;  %v2672_v47 = vld [vmem:[%s3348_s24 + $0x20] sm:$0xf]  ;;  %v1935_v59 = vshrl.u32 %v2676_v52, 16 }
  0x62   : > { %v713_v2 = vsel %vm3419_vm2, %v708_v60, %v712_v48  ;;  %v3246_v48 = vld [vmem:[%s3723_s1 + $0x218] sm:$0xff]   ;;  %v3247_v54 = vld [vmem:[%s3723_s1 + $0x220] sm:$0xff]   ;;  %v1910_v56 = vshll.u32 %v2672_v47, 16  ;;  %v1938_v60 = vshll.u32 %v2676_v52, 16 }
  0x63   : > { %2907 = vmatpush3.bf16.msra.mxu1 %v3215_v4  ;;  %v3237_v4 = vld [vmem:[%s3348_s24 + $0x90] ss:$8 sps:$4 sm:$0xff]  }
  0x64   : > { %3003 = vmatpush3.bf16.msra.mxu0 %v3216_v6  ;;  %2916 = vmatprep.subr.bf16.mxu1 %v3217_v7  ;;  %v2469_v6 = vcombine.low %v713_v2, %v727_v3  ;;  %v2671_v2 = vld [vmem:[%s3348_s24 + $0x1c] sm:$0x1]  ;;  %v2673_v3 = vld [vmem:[%s3348_s24 + $0x24] sm:$0x1] }
  0x65   : > { %3012 = vmatprep.subr.bf16.mxu0 %v3219_v10  ;;  %v1916_v15 = vshll.u32 %v2673_v3, 16 }
  0x66   : > { %2909 = vmatmul.mubr.bf16.vlgmr.msra.gmra.mrb[0].mxu1 %v2467_v13  ;;  %v3236_v13 = vld [vmem:[%s3723_s1 + $0x1f8] sm:$0xff]  }
  0x67   : > { %2917 = vmatpush3.bf16.msra.mxu1 %v3217_v7  ;;  %3005 = vmatmul.mubr.bf16.vlgmr.msra.gmra.mrb[0].mxu0 %v3220_v11  ;;  %v3239_v7 = vld [vmem:[%s3348_s24 + $0x50] ss:$8 sps:$4 sm:$0xff]   ;;  %v1918_v29 = vrot.slane %v1916_v15, 5 }
  0x68   : > { %3013 = vmatpush3.bf16.msra.mxu0 %v3219_v10  ;;  %2918 = vmatprep.subr.bf16.mxu1 %v3221_v14  ;;  %v3231_v10 = vld [vmem:[%s3723_s1 + $0xf0] sm:$0xff]  }
  0x69   : > { %3014 = vmatprep.subr.bf16.mxu0 %v3222_v18  ;;  %3008 = vmatprep.mubr.bf16.mxu0 %v3232_v55  ;;  %v3233_v11 = vld [vmem:[%s3723_s1 + $0x1f0] sm:$0xff]   ;;  %v1907_v55 = vshrl.u32 %v2672_v47, 16 }
  0x6a   : > { %2912 = vmatprep.mubr.bf16.mxu1 %v2468_v63  ;;  %v1898_v63 = vrot.slane %v1896_v51, 5 }
  0x6b   : > { %2919 = vmatpush3.bf16.msra.mxu1 %v3221_v14  ;;  %v2666_v14 = vld [vmem:[%s3348_s24 + $0x8] sm:$0xf]  ;;  %v1909_v0 = vrot.slane %v1907_v55, 4 }
  0x6c   : > { %3015 = vmatpush3.bf16.msra.mxu0 %v3222_v18  ;;  %2920 = vmatprep.subr.bf16.mxu1 %v3223_v37  ;;  %v1865_v18 = vshrl.u32 %v2666_v14, 16  ;;  %v1868_v19 = vshll.u32 %v2666_v14, 16 }
  0x6d   : > { %3016 = vmatprep.subr.bf16.mxu0 %v3224_v42 }
  0x6e   : > { %2913 = vmatmul.mubr.bf16.gmra.mrb[4].mxu1 %v2469_v6  ;;  %v1867_v23 = vrot.slane %v1865_v18, 4  ;;  %v1870_v24 = vrot.slane %v1868_v19, 5 }
  0x6f   : > { %2921 = vmatpush3.bf16.msra.mxu1 %v3223_v37  ;;  %3009 = vmatmul.mubr.bf16.gmra.mrb[4].mxu0 %v3234_v61  ;;  %v1876_v37 = vrot.slane %v1874_v25, 5  ;;  %v3248_v61 = vld [vmem:[%s3723_s1 + $0x228] sm:$0xff]   ;;  %v3252_v25 = vld [vmem:[%s3723_s1 + $0x238] sm:$0xff]  }
  0x70   : > { %3017 = vmatpush3.bf16.msra.mxu0 %v3224_v42  ;;  %2922 = vmatprep.subr.bf16.mxu1 %v3225_v58  ;;  %v1871_v32 = vor.u32 %v1870_v24, %v1867_v23  ;;  %v1891_v42 = vsel %vm3419_vm2, %v1886_v39, %v1890_v38  ;;  %v2681_v39 = vld [vmem:[%s3348_s24 + $0x44] sm:$0x1] }
  0x71   : > { %3018 = vmatprep.subr.bf16.mxu0 %v3226_v62  ;;  %2932 = vmatprep.mubr.bf16.mxu1 %v3237_v4  ;;  %v2678_v4 = vld [vmem:[%s3348_s24 + $0x38] sm:$0xf]  ;;  %v1972_v45 = vshll.u32 %v2681_v39, 16 }
  0x72   : > { %3028 = vmatprep.mubr.bf16.mxu0 %v3239_v7  ;;  %v1872_v36 = vrot.slane %v1871_v32, 4  ;;  %v1937_v7 = vrot.slane %v1935_v59, 4  ;;  %v1949_v16 = vshrl.u32 %v2678_v4, 16  ;;  %v1952_v17 = vshll.u32 %v2678_v4, 16  ;;  %v3254_v59 = vld [vmem:[%s3725_s3 + $0x8] sm:$0xff]  }
  0x73   : > { %2923 = vmatpush3.bf16.msra.mxu1 %v3225_v58  ;;  %v1924_v58 = vshll.u32 %v2674_v49, 16 }
  0x74   : > { %3019 = vmatpush3.bf16.msra.mxu0 %v3226_v62  ;;  %2924 = vmatprep.subr.bf16.mxu1 %v3227_v1  ;;  %v1877_v41 = vsel %vm3419_vm2, %v1872_v36, %v1876_v37  ;;  %v1895_v62 = vrot.slane %v1893_v50, 4  ;;  %v1954_v32 = vrot.slane %v1952_v17, 5 }
  0x75   : > { %3020 = vmatprep.subr.bf16.mxu0 %v3228_v5  ;;  %v2698_v46 = vcombine.low %v1877_v41, %v1891_v42  ;;  %v1926_v6 = vrot.slane %v1924_v58, 5  ;;  %v3253_v58 = vld [vmem:[%s3725_s3] sm:$0xff]  }
  0x77   : > { %2925 = vmatpush3.bf16.msra.mxu1 %v3227_v1  ;;  %v1912_v1 = vrot.slane %v1910_v56, 5 }
  0x78   : > { %3021 = vmatpush3.bf16.msra.mxu0 %v3228_v5  ;;  %2926 = vmatprep.subr.bf16.mxu1 %v3229_v8  ;;  %v1923_v5 = vrot.slane %v1921_v57, 4 }
  0x79   : > { %3022 = vmatprep.subr.bf16.mxu0 %v3230_v9  ;;  %v1913_v14 = vor.u32 %v1912_v1, %v1909_v0  ;;  %v3260_v0 = vld [vmem:[%s3725_s3 + $0x38] sm:$0xff]  }
  0x7a   : > { %v1927_v21 = vor.u32 %v1926_v6, %v1923_v5 }
  0x7b   : > { %2927 = vmatpush3.bf16.msra.mxu1 %v3229_v8  ;;  %v1940_v8 = vrot.slane %v1938_v60, 5  ;;  %v1914_v28 = vrot.slane %v1913_v14, 4  ;;  %v3255_v60 = vld [vmem:[%s3725_s3 + $0x10] sm:$0xff]  }
  0x7c   : > { %3023 = vmatpush3.bf16.msra.mxu0 %v3230_v9  ;;  %2928 = vmatprep.subr.bf16.mxu1 %v3231_v10  ;;  %v2680_v9 = vld [vmem:[%s3348_s24 + $0x40] sm:$0xf] }
  0x7d   : > { %3024 = vmatprep.subr.bf16.mxu0 %v3233_v11  ;;  %v1963_v18 = vshrl.u32 %v2680_v9, 16  ;;  %v1966_v19 = vshll.u32 %v2680_v9, 16  ;;  %v1941_v23 = vor.u32 %v1940_v8, %v1937_v7  ;;  %v1919_v42 = vsel %vm3419_vm2, %v1914_v28, %v1918_v29 }
  0x7f   : > { %2929 = vmatpush3.bf16.msra.mxu1 %v3231_v10  ;;  %v2675_v10 = vld [vmem:[%s3348_s24 + $0x2c] sm:$0x1]  ;;  %v1968_v34 = vrot.slane %v1966_v19, 5  ;;  %v1942_v37 = vrot.slane %v1941_v23, 4 }
  0x80   : > { %3025 = vmatpush3.bf16.msra.mxu0 %v3233_v11  ;;  %2930 = vmatprep.subr.bf16.mxu1 %v3235_v12  ;;  %v2677_v11 = vld [vmem:[%s3348_s24 + $0x34] sm:$0x1] }
  0x81   : > { %3026 = vmatprep.subr.bf16.mxu0 %v3236_v13  ;;  %v1944_v24 = vshll.u32 %v2677_v11, 16 }
  0x83   : > { %2931 = vmatpush3.bf16.msra.mxu1 %v3235_v12  ;;  %v1899_v12 = vor.u32 %v1898_v63, %v1895_v62  ;;  %v1946_v38 = vrot.slane %v1944_v24, 5  ;;  %v3258_v62 = vld [vmem:[%s3725_s3 + $0x28] sm:$0xff]   ;;  %v3259_v63 = vld [vmem:[%s3725_s3 + $0x30] sm:$0xff]  }
  0x84   : > { %3027 = vmatpush3.bf16.msra.mxu0 %v3236_v13  ;;  %v1902_v13 = vshll.u32 %v2671_v2, 16  ;;  %3060 = vmatprep.subr.bf16.mxu1 %v3253_v58 }
  0x85   : > { %3036 = vmatprep.subr.bf16.mxu0 %v3240_v22  ;;  %v1900_v26 = vrot.slane %v1899_v12, 4  ;;  %v1947_v47 = vsel %vm3419_vm2, %v1942_v37, %v1946_v38 }
  0x86   : > { %2933 = vmatmul.mubr.bf16.vlgmr.msra.gmra.mrb[0].mxu1 %v3238_v27  ;;  %v1904_v27 = vrot.slane %v1902_v13, 5 }
  0x87   : > { %3029 = vmatmul.mubr.bf16.vlgmr.msra.gmra.mrb[0].mxu0 %v3241_v30  ;;  %2936 = vmatprep.mubr.bf16.mxu1 %v3243_v31  ;;  %v2679_v30 = vld [vmem:[%s3348_s24 + $0x3c] sm:$0x1]  ;;  %v1951_v31 = vrot.slane %v1949_v16, 4 }
  0x88   : > { %3037 = vmatpush3.bf16.msra.mxu0 %v3240_v22  ;;  %3032 = vmatprep.mubr.bf16.mxu0 %v3249_v33  ;;  %v1930_v22 = vshll.u32 %v2675_v10, 16  ;;  %v1965_v33 = vrot.slane %v1963_v18, 4  ;;  %v1958_v41 = vshll.u32 %v2679_v30, 16  ;;  %v2710_v10 = vld [vmem:[%s3724_s2] ss:$0 sm:$0xff] }
  0x89   : > { %3038 = vmatprep.subr.bf16.mxu0 %v3242_v35  ;;  %3061 = vmatpush3.bf16.msra.mxu1 %v3253_v58 }
  0x8a   : > { %v1932_v36 = vrot.slane %v1930_v22, 5  ;;  %v1960_v49 = vrot.slane %v1958_v41, 5  ;;  %3062 = vmatprep.subr.bf16.mxu1 %v3254_v59 }
  0x8c   : > { %3039 = vmatpush3.bf16.msra.mxu0 %v3242_v35  ;;  %v1928_v35 = vrot.slane %v1927_v21, 4 }
  0x8d   : > { %3040 = vmatprep.subr.bf16.mxu0 %v3245_v40  ;;  %3063 = vmatpush3.bf16.msra.mxu1 %v3254_v59  ;;  %v2294_v59 = vld [vmem:[%s3693_s19 + $0x8] sm:$0xff] }
  0x8e   : > { %2937 = vmatmul.mubr.bf16.gmra.mrb[4].mxu1 %v3244_v43  ;;  %v1955_v43 = vor.u32 %v1954_v32, %v1951_v31  ;;  %3064 = vmatprep.subr.bf16.mxu1 %v3255_v60 }
  0x8f   : > { %3033 = vmatmul.mubr.bf16.gmra.mrb[4].mxu0 %v3250_v44  ;;  %v1969_v44 = vor.u32 %v1968_v34, %v1965_v33 }
  0x90   : > { %3041 = vmatpush3.bf16.msra.mxu0 %v3245_v40  ;;  %3052 = vmatprep.mubr.bf16.mxu0 %v2698_v46  ;;  %v1905_v40 = vsel %vm3419_vm2, %v1900_v26, %v1904_v27  ;;  %v1933_v46 = vsel %vm3419_vm2, %v1928_v35, %v1932_v36  ;;  %v1956_v51 = vrot.slane %v1955_v43, 4 }
  0x91   : > { %3042 = vmatprep.subr.bf16.mxu0 %v3246_v48  ;;  %v2700_v50 = vcombine.low %v1933_v46, %v1947_v47  ;;  %v1970_v52 = vrot.slane %v1969_v44, 4  ;;  %3065 = vmatpush3.bf16.msra.mxu1 %v3255_v60  ;;  %v2711_v46 = vld [vmem:[%s3726_s4] ss:$0 sm:$0xff] }
  0x92   : > { %v1961_v55 = vsel %vm3419_vm2, %v1956_v51, %v1960_v49  ;;  %3066 = vmatprep.subr.bf16.mxu1 %v3256_v53  ;;  %v2293_v51 = vld [vmem:[%s3693_s19] sm:$0xff] }
  0x94   : > { %3043 = vmatpush3.bf16.msra.mxu0 %v3246_v48  ;;  %v2699_v48 = vcombine.low %v1905_v40, %v1919_v42 }
  0x95   : > { %3044 = vmatprep.subr.bf16.mxu0 %v3247_v54  ;;  %3067 = vmatpush3.bf16.msra.mxu1 %v3256_v53 }
  0x98   : > { %3045 = vmatpush3.bf16.msra.mxu0 %v3247_v54  ;;  %v1974_v54 = vrot.slane %v1972_v45, 5 }
  0x99   : > { %3046 = vmatprep.subr.bf16.mxu0 %v3248_v61 }
  0x9a   : > { %v1975_v56 = vsel %vm3419_vm2, %v1970_v52, %v1974_v54 }
  0x9b   : > { %v2701_v57 = vcombine.low %v1961_v55, %v1975_v56  ;;  %v2296_v55 = vld [vmem:[%s3693_s19 + $0x18] sm:$0xff] }
  0x9c   : > { %3047 = vmatpush3.bf16.msra.mxu0 %v3248_v61  ;;  %v3257_v61 = vld [vmem:[%s3725_s3 + $0x20] sm:$0xff]  }
  0x9d   : > { %3048 = vmatprep.subr.bf16.mxu0 %v3251_v20  ;;  %3068 = vmatprep.subr.bf16.mxu1 %v3257_v61 }
  0x9e   : > { %3069 = vmatpush3.bf16.msra.mxu1 %v3257_v61 }
  0x9f   : > { %3070 = vmatprep.subr.bf16.mxu1 %v3258_v62 }
  0xa0   : > { %3049 = vmatpush3.bf16.msra.mxu0 %v3251_v20 }
  0xa1   : > { %3050 = vmatprep.subr.bf16.mxu0 %v3252_v25 }
  0xa2   : > { %3071 = vmatpush3.bf16.msra.mxu1 %v3258_v62 }
  0xa3   : > { %3072 = vmatprep.subr.bf16.mxu1 %v3259_v63 }
  0xa4   : > { %3051 = vmatpush3.bf16.msra.mxu0 %v3252_v25 }
  0xa6   : > { %3073 = vmatpush3.bf16.msra.mxu1 %v3259_v63 }
  0xa7   : > { %3053 = vmatmul.mubr.bf16.vlgmr.msra.gmra.mrb[0].mxu0 %v2699_v48  ;;  %3074 = vmatprep.subr.bf16.mxu1 %v3260_v0  ;;  %v2295_v48 = vld [vmem:[%s3693_s19 + $0x10] sm:$0xff] }
  0xa8   : > { %3056 = vmatprep.mubr.bf16.mxu0 %v2700_v50 }
  0xaa   : > { %3075 = vmatpush3.bf16.msra.mxu1 %v3260_v0 }
  0xaf   : > { %3057 = vmatmul.mubr.bf16.gmra.mrb[4].mxu0 %v2701_v57 }
 0x159   : > { %v2934_v1 = vpop.f32.mrb[0].mxu1 }
 0x15a   : > { %v1014_v2 = vpop.f32.mrb[1].mxu1 }
 0x15b   : > { %v2935_v3 = vpop.f32.mrb[2].mxu1 }
 0x15c   : > { %v1017_v4 = vpop.f32.mrb[3].mxu1 }
 0x161   : > { %v2938_v5 = vpop.f32.mrb[4].mxu1 }
 0x162   : > { %v1030_v6 = vpop.f32.mrb[5].mxu1 }
 0x163   : > { %v2939_v7 = vpop.f32.mrb[6].mxu1 }
 0x164   : > { %v1033_v8 = vpop.f32.mrb[7].mxu1 }
 0x17a   : > { %v3054_v9 = vpop.f32.mrb[0].mxu0 }
 0x17b   : > { %v3084_v11 = vadd.f32 %v3054_v9, %v2934_v1  ;;  %v2091_v12 = vpop.f32.mrb[1].mxu0 }
 0x17c   : > { %v3085_v13 = vadd.f32 %v2091_v12, %v1014_v2  ;;  %v3055_v14 = vpop.f32.mrb[2].mxu0 }
 0x17d   : > { %v2139_v15 = vadd.f32 %v3084_v11, %v2710_v10  ;;  %v3086_v16 = vadd.f32 %v3055_v14, %v2935_v3  ;;  %v2094_v17 = vpop.f32.mrb[3].mxu0  ;;  %v2298_v14 = vld [vmem:[%s3693_s19 + $0x28] sm:$0xff] }
 0x17e   : > { %v2137_v18 = vadd.f32 %v3085_v13, %v2710_v10  ;;  %v3087_v19 = vadd.f32 %v2094_v17, %v1017_v4  ;;  %v2299_v4 = vld [vmem:[%s3693_s19 + $0x30] sm:$0xff] }
 0x17f   : > { %v2140_v20 = vadd.f32 %v3086_v16, %v2710_v10  ;;  %v2147_v22 = vmax.f32 %v2139_v15, 0.0 }
 0x180   : > { %v2138_v21 = vadd.f32 %v3087_v19, %v2710_v10  ;;  %v2145_v24 = vmax.f32 %v2137_v18, 0.0 }
 0x181   : > { %v2148_v23 = vmax.f32 %v2140_v20, 0.0 }
 0x182   : > { %v2146_v25 = vmax.f32 %v2138_v21, 0.0  ;;  %v3058_v26 = vpop.f32.mrb[4].mxu0 }
 0x183   : > { %v2154_v27 = vpack.c.bf16 %v2148_v23, %v2147_v22  ;;  %v3088_v28 = vadd.f32 %v3058_v26, %v2938_v5  ;;  %v2107_v29 = vpop.f32.mrb[5].mxu0 }
 0x184   : > { %v3089_v30 = vadd.f32 %v2107_v29, %v1030_v6  ;;  %v3059_v31 = vpop.f32.mrb[6].mxu0  ;;  %v2153_v32 = vpack.c.bf16 %v2146_v25, %v2145_v24 }
 0x185   : > { %v2143_v33 = vadd.f32 %v3088_v28, %v2710_v10  ;;  %v3090_v34 = vadd.f32 %v3059_v31, %v2939_v7  ;;  %v2110_v35 = vpop.f32.mrb[7].mxu0  ;;  %v2297_v7 = vld [vmem:[%s3693_s19 + $0x20] sm:$0xff] }
 0x186   : > { %v2141_v36 = vadd.f32 %v3089_v30, %v2710_v10  ;;  %v3091_v37 = vadd.f32 %v2110_v35, %v1033_v8  ;;  %3076 = vmatprep.mubr.bf16.mxu1 %v2153_v32 }
 0x187   : > { %v2144_v38 = vadd.f32 %v3090_v34, %v2710_v10  ;;  %3077 = vmatmul.mubr.bf16.vlgmr.msra.gmra.mrb[8].mxu1 %v2154_v27  ;;  %v2151_v40 = vmax.f32 %v2143_v33, 0.0 }
 0x188   : > { %v2142_v39 = vadd.f32 %v3091_v37, %v2710_v10  ;;  %v2149_v42 = vmax.f32 %v2141_v36, 0.0  ;;  %v2300_v10 = vld [vmem:[%s3693_s19 + $0x38] sm:$0xff] }
 0x189   : > { %v2152_v41 = vmax.f32 %v2144_v38, 0.0 }
 0x18a   : > { %v2150_v43 = vmax.f32 %v2142_v39, 0.0 }
 0x18b   : > { %v2156_v44 = vpack.c.bf16 %v2152_v41, %v2151_v40 }
 0x18c   : > { %v2155_v45 = vpack.c.bf16 %v2150_v43, %v2149_v42 }
 0x18e   : > { %3080 = vmatprep.mubr.bf16.mxu1 %v2155_v45 }
 0x18f   : > { %3081 = vmatmul.mubr.bf16.gmra.mrb[12].mxu1 %v2156_v44 }
 0x25a   : > { %v3078_v47 = vpop.f32.mrb[8].mxu1 }
 0x25b   : > { %v2271_v49 = vadd.f32 %v3078_v47, %v2711_v46  ;;  %v2262_v50 = vpop.f32.mrb[9].mxu1 }
 0x25c   : > { %v2263_v52 = vadd.f32 %v2711_v46, %v2262_v50  ;;  %v3079_v54 = vpop.f32.mrb[10].mxu1 }
 0x25d   : > { %v2303_v56 = vadd.f32 %v2295_v48, %v2271_v49  ;;  %v2274_v57 = vadd.f32 %v3079_v54, %v2711_v46  ;;  %v2265_v58 = vpop.f32.mrb[11].mxu1 }
 0x25e   : > { %v2301_v60 = vadd.f32 %v2293_v51, %v2263_v52  ;;  %v2266_v53 = vadd.f32 %v2711_v46, %v2265_v58 }
 0x25f   : > { %v2311_v61 = vmax.f32 %v2303_v56, 0.0  ;;  %v2304_v62 = vadd.f32 %v2296_v55, %v2274_v57 }
 0x260   : > { %v2309_v63 = vmax.f32 %v2301_v60, 0.0  ;;  %v2302_v0 = vadd.f32 %v2294_v59, %v2266_v53 }
 0x261   : > { %2319 = vst [vmem:[%s3705_s25 + $0x10] sm:$0xff] %v2311_v61  ;;  %v2312_v1 = vmax.f32 %v2304_v62, 0.0 }
 0x262   : > { %2317 = vst [vmem:[%s3705_s25] sm:$0xff] %v2309_v63  ;;  %v2310_v2 = vmax.f32 %v2302_v0, 0.0  ;;  %v3082_v3 = vpop.f32.mrb[12].mxu1 }
 0x263   : > { %2320 = vst [vmem:[%s3705_s25 + $0x18] sm:$0xff] %v2312_v1  ;;  %v2287_v5 = vadd.f32 %v3082_v3, %v2711_v46  ;;  %v2278_v6 = vpop.f32.mrb[13].mxu1 }
 0x264   : > { %2318 = vst [vmem:[%s3705_s25 + $0x8] sm:$0xff] %v2310_v2  ;;  %v2279_v8 = vadd.f32 %v2711_v46, %v2278_v6  ;;  %v3083_v9 = vpop.f32.mrb[14].mxu1 }
 0x265   : > { %v2307_v11 = vadd.f32 %v2299_v4, %v2287_v5  ;;  %v2290_v12 = vadd.f32 %v3083_v9, %v2711_v46  ;;  %v2281_v13 = vpop.f32.mrb[15].mxu1 }
 0x266   : > { %v2305_v15 = vadd.f32 %v2297_v7, %v2279_v8  ;;  %v2282_v16 = vadd.f32 %v2711_v46, %v2281_v13 }
 0x267   : > { %v2315_v17 = vmax.f32 %v2307_v11, 0.0  ;;  %v2308_v18 = vadd.f32 %v2300_v10, %v2290_v12 }
 0x268   : > { %v2313_v19 = vmax.f32 %v2305_v15, 0.0  ;;  %v2306_v20 = vadd.f32 %v2298_v14, %v2282_v16 }
 0x269   : > { %2323 = vst [vmem:[%s3705_s25 + $0x30] sm:$0xff] %v2315_v17  ;;  %v2316_v21 = vmax.f32 %v2308_v18, 0.0 }
 0x26a   : > { %2321 = vst [vmem:[%s3705_s25 + $0x20] sm:$0xff] %v2313_v19  ;;  %v2314_v22 = vmax.f32 %v2306_v20, 0.0 }
 0x26b   : > { %2324 = vst [vmem:[%s3705_s25 + $0x38] sm:$0xff] %v2316_v21 }
 0x26c   : > { %2322 = vst [vmem:[%s3705_s25 + $0x28] sm:$0xff] %v2314_v22 }
 0x26d PF: > { %s16_s21 = sadd.s32 1, %s3267_s21  }
 0x26e   : > { %p13_p4 = scmp.ge.s32.totalorder %s16_s21, 4  }
 0x270   :  { %15 = sbr.rel (!%p13_p4) target bundleno = 1 (0x1), region = 90 }

</bundles_post_ra>
